<compile_context>
chip_gen: v5e
topology: v5e:2x2
jax: 0.10.0
libtpu: 0.0.40
codegen_flags: <defaults>
</compile_context>

<pallas_src>
import jax
import jax.numpy as jnp
import numpy as np
from jax import lax
from jax.experimental import pallas as pl
from jax.experimental.pallas import tpu as pltpu


def _round_up(x, m):
    return (x + m - 1) // m * m


# ----------------------------- fused forward kernel ------------------------- #
#   x -> folded-in affine -> ReLU -> [ lin -> FIR -> affine -> ReLU ]*L
#     -> folded-out affine -> masked softmax (padded lanes excluded)

def _make_fused_kernel(n_layers, lorder, rorder, lstride, rstride, d_out,
                       Bt, T, DP, mxu_dtype):
    pad_l = (lorder - 1) * lstride
    pad_r = rorder * rstride
    M = Bt * T
    f32 = jnp.float32

    def kernel(x_ref, w_ref, b_ref, taps_ref, o_ref, fir_ref):
        # Zero the FIR scratch once; only its center is rewritten per layer,
        # the halos stay zero (zero left-context cache / zero right padding).
        fir_ref[...] = jnp.zeros_like(fir_ref)

        # Folded input affine (in_linear1 ∘ in_linear2) + ReLU.
        xm = x_ref[...].reshape(M, DP)                       # (M, DP) mxu_dtype
        h = jnp.dot(xm, w_ref[0], preferred_element_type=f32) + b_ref[0:1, :]
        h = jnp.maximum(h, 0.0)                              # f32 activations

        for l in range(n_layers):
            lin_w = w_ref[1 + 2 * l]
            aff_w = w_ref[2 + 2 * l]
            aff_b = b_ref[1 + l:2 + l, :]

            # LinearTransform (no bias).
            p = jnp.dot(h.astype(mxu_dtype), lin_w, preferred_element_type=f32)

            # FSMN depthwise FIR via the zero-padded scratch:
            #   out[t] = sum_k wl'[k] * p[t-(lorder-1-k)*lstride]
            #          + sum_k wr[k]  * p[t+(k+1)*rstride]
            # (identity folded into wl'[lorder-1] wrapper-side; padding = 0)
            fir_ref[:, pad_l:pad_l + T, :] = p.reshape(Bt, T, DP)
            f = jnp.zeros((Bt, T, DP), f32)
            for k in range(lorder):                          # left taps (incl. t=0)
                off = k * lstride
                tap = taps_ref[l, k:k + 1, :].reshape(1, 1, DP)
                f = f + tap * fir_ref[:, off:off + T, :]
            for k in range(rorder):                          # right (lookahead) taps
                off = pad_l + (k + 1) * rstride
                tap = taps_ref[l, lorder + k:lorder + k + 1, :].reshape(1, 1, DP)
                f = f + tap * fir_ref[:, off:off + T, :]

            # AffineTransform + RectifiedLinear.
            h = jnp.dot(f.reshape(M, DP).astype(mxu_dtype), aff_w,
                        preferred_element_type=f32) + aff_b
            h = jnp.maximum(h, 0.0)

        # Folded output affine (out_linear1 ∘ out_linear2).
        logits = (jnp.dot(h.astype(mxu_dtype), w_ref[1 + 2 * n_layers],
                          preferred_element_type=f32)
                  + b_ref[1 + n_layers:2 + n_layers, :])

        # Softmax over the real output lanes only (padded lanes masked), in f32.
        lane = lax.broadcasted_iota(jnp.int32, logits.shape, 1)
        logits = jnp.where(lane < d_out, logits, -1e30)
        m = jnp.max(logits, axis=-1, keepdims=True)
        e = jnp.exp(logits - m)
        s = jnp.sum(e, axis=-1, keepdims=True)
        probs = e * pl.reciprocal(s, approx=False)   # exact: keeps sum-to-1 @1e-5
        o_ref[...] = probs.reshape(Bt, T, DP).astype(o_ref.dtype)

    return kernel


# -------------------------------- wrapper ----------------------------------- #

def fsmn_forward(params, x, cfg, *, weight_dtype=jnp.bfloat16, return_padded=False):
    """x: (B, T, input_dim) -> (B, T, output_dim) softmax probabilities."""
    B, T, d_in = x.shape
    lorder, rorder = cfg["lorder"], cfg["rorder"]
    lstride, rstride = cfg["lstride"], cfg["rstride"]
    d_out = cfg["output_dim"]
    n_layers = cfg["fsmn_layers"]
    proj_dim = cfg["proj_dim"]
    assert n_layers >= 1 and lorder >= 1

    dims = [d_in, cfg["input_affine_dim"], cfg["linear_dim"], proj_dim,
            cfg["output_affine_dim"], d_out]
    DP = _round_up(max(dims), 128)      # lane-dense internal width
    f32 = jnp.float32

    def pad_mat(w):
        return jnp.pad(w.astype(f32), ((0, DP - w.shape[0]), (0, DP - w.shape[1])))

    def pad_vec(b):
        return jnp.pad(b.astype(f32), (0, DP - b.shape[0]))

    def pad_taps(w):                    # (order, D) -> (order, DP)
        return jnp.pad(w.astype(f32), ((0, 0), (0, DP - w.shape[1])))

    # ---- fold the two input / output affine pairs (exact composition) ------
    in_w = params["in_w1"].astype(f32) @ params["in_w2"].astype(f32)
    in_b = (params["in_b1"].astype(f32) @ params["in_w2"].astype(f32)
            + params["in_b2"].astype(f32))
    out_w = params["out_w1"].astype(f32) @ params["out_w2"].astype(f32)
    out_b = (params["out_b1"].astype(f32) @ params["out_w2"].astype(f32)
             + params["out_b2"].astype(f32))

    # ---- stack all weights into 3 resident arrays ---------------------------
    mats = [pad_mat(in_w)]
    biases = [pad_vec(in_b)]
    taps = []
    for layer in params["blocks"]:
        mats.append(pad_mat(layer["lin_w"]))
        mats.append(pad_mat(layer["aff_w"]))
        biases.append(pad_vec(layer["aff_b"]))
        # fold the identity (out = p + FIR) into the zero-shift left tap
        wl = pad_taps(layer["wl"]).at[lorder - 1, :proj_dim].add(1.0)
        t = [wl]
        if rorder > 0:
            t.append(pad_taps(layer["wr"]))
        taps.append(jnp.concatenate(t, axis=0))
    mats.append(pad_mat(out_w))
    biases.append(pad_vec(out_b))

    W = jnp.stack(mats, 0).astype(weight_dtype)   # (2+2L, DP, DP) MXU operands
    Bv = jnp.stack(biases, 0)                     # (2+L, DP)           f32
    Tp = jnp.stack(taps, 0)                       # (L, lorder+rorder, DP) f32

    # ---- batch blocking: many rows per MXU push, batches kept separate ------
    Bt = max(1, min(B, -(-128 // max(T, 1))))     # target ~>=128 rows per dot
    Bp = -(-B // Bt) * Bt                         # pad batch to a multiple of Bt
    nsteps = Bp // Bt
    x_pad = jnp.pad(x.astype(f32),
                    ((0, Bp - B), (0, 0), (0, DP - d_in))).astype(weight_dtype)

    pad_l = (lorder - 1) * lstride
    pad_r = rorder * rstride
    Lq = pad_l + T + pad_r                        # zero-padded FIR scratch length

    kernel = _make_fused_kernel(n_layers, lorder, rorder, lstride, rstride,
                                d_out, Bt, T, DP, weight_dtype)

    n_mats = 2 + 2 * n_layers
    w_itemsize = np.dtype(weight_dtype).itemsize
    flops = int(2 * Bp * T * DP * DP * n_mats
                + 2 * Bp * T * DP * (lorder + rorder) * n_layers)
    transcendentals = int(Bp * T * DP)
    bytes_accessed = int(x_pad.size * w_itemsize + Bp * T * DP * 4
                         + W.size * w_itemsize + Bv.size * 4 + Tp.size * 4)

    out = pl.pallas_call(
        kernel,
        out_shape=jax.ShapeDtypeStruct((Bp, T, DP), jnp.float32),
        grid_spec=pltpu.PrefetchScalarGridSpec(
            num_scalar_prefetch=0,
            grid=(nsteps,),
            in_specs=[
                pl.BlockSpec((Bt, T, DP), lambda i: (i, 0, 0)),   # batch tile
                pl.BlockSpec(W.shape, lambda i: (0, 0, 0)),       # resident weights
                pl.BlockSpec(Bv.shape, lambda i: (0, 0)),         # resident biases
                pl.BlockSpec(Tp.shape, lambda i: (0, 0, 0)),      # resident FIR taps
            ],
            out_specs=pl.BlockSpec((Bt, T, DP), lambda i: (i, 0, 0)),
            scratch_shapes=[pltpu.VMEM((Bt, Lq, DP), jnp.float32)],
        ),
        compiler_params=pltpu.CompilerParams(
            dimension_semantics=("parallel",),
            vmem_limit_bytes=32 * 1024 * 1024,    # v7x-safe (<= ~48 MiB)
        ),
        cost_estimate=pl.CostEstimate(
            flops=flops,
            transcendentals=transcendentals,
            bytes_accessed=bytes_accessed,
        ),
    )(x_pad, W, Bv, Tp)

    out = out[:B]
    if return_padded:
        return out          # lane-dense (B, T, DP) slab; let the consumer slice
    return out[:, :, :d_out]


# ------------------------------ pure-JAX reference --------------------------- #

def fsmn_reference(params, x, cfg):
    B, T, _ = x.shape
    hp = jax.lax.Precision.HIGHEST

    def lin(h, w, b=None):
        y = jnp.matmul(h, w, precision=hp)
        return y if b is None else y + b

    h = lin(x, params["in_w1"], params["in_b1"])
    h = jnp.maximum(lin(h, params["in_w2"], params["in_b2"]), 0.0)
    for layer in params["blocks"]:
        p = lin(h, layer["lin_w"])
        acc = p
        for k in range(cfg["lorder"]):
            shift = (cfg["lorder"] - 1 - k) * cfg["lstride"]
            xs = jnp.pad(p, ((0, 0), (shift, 0), (0, 0)))[:, :T, :] if shift else p
            acc = acc + xs * layer["wl"][k]
        for k in range(cfg["rorder"]):
            shift = (k + 1) * cfg["rstride"]
            xs = jnp.pad(p, ((0, 0), (0, shift), (0, 0)))[:, shift:shift + T, :]
            acc = acc + xs * layer["wr"][k]
        h = jnp.maximum(lin(acc, layer["aff_w"], layer["aff_b"]), 0.0)
    h = lin(h, params["out_w1"], params["out_b1"])
    h = lin(h, params["out_w2"], params["out_b2"])
    return jax.nn.softmax(h, axis=-1)


# --------------------------------- main -------------------------------------- #

if __name__ == "__main__":
    # use accurate f32 matmuls for the wrapper-side folding and the reference
    jax.config.update("jax_default_matmul_precision", "highest")

    cfg = dict(
        input_dim=32, input_affine_dim=64, fsmn_layers=2, linear_dim=64,
        proj_dim=32, lorder=3, rorder=2, lstride=1, rstride=1,
        output_affine_dim=32, output_dim=16,
    )
    B, T = 2, 8

    key = jax.random.PRNGKey(0)

    def nrm(k, shape, scale=0.1):
        return scale * jax.random.normal(k, shape, dtype=jnp.float32)

    keys = iter(jax.random.split(key, 64))
    params = {
        "in_w1": nrm(next(keys), (cfg["input_dim"], cfg["input_affine_dim"])),
        "in_b1": nrm(next(keys), (cfg["input_affine_dim"],)),
        "in_w2": nrm(next(keys), (cfg["input_affine_dim"], cfg["linear_dim"])),
        "in_b2": nrm(next(keys), (cfg["linear_dim"],)),
        "out_w1": nrm(next(keys), (cfg["linear_dim"], cfg["output_affine_dim"])),
        "out_b1": nrm(next(keys), (cfg["output_affine_dim"],)),
        "out_w2": nrm(next(keys), (cfg["output_affine_dim"], cfg["output_dim"])),
        "out_b2": nrm(next(keys), (cfg["output_dim"],)),
        "blocks": [],
    }
    for _ in range(cfg["fsmn_layers"]):
        params["blocks"].append({
            "lin_w": nrm(next(keys), (cfg["linear_dim"], cfg["proj_dim"])),
            # depthwise conv weights: conv_left.weight[d,0,k,0] -> wl[k,d]
            "wl": nrm(next(keys), (cfg["lorder"], cfg["proj_dim"])),
            "wr": nrm(next(keys), (cfg["rorder"], cfg["proj_dim"]))
                  if cfg["rorder"] > 0 else None,
            "aff_w": nrm(next(keys), (cfg["proj_dim"], cfg["linear_dim"])),
            "aff_b": nrm(next(keys), (cfg["linear_dim"],)),
        })

    x = jax.random.normal(next(keys), (B, T, cfg["input_dim"]), dtype=jnp.float32)

    ref = jax.block_until_ready(fsmn_reference(params, x, cfg))

    # f32 MXU operands: near-exact vs. the unfolded reference.
    out32 = jax.block_until_ready(
        fsmn_forward(params, x, cfg, weight_dtype=jnp.float32))
    assert out32.shape == (B, T, cfg["output_dim"])
    assert np.allclose(np.asarray(out32), np.asarray(ref), atol=1e-4, rtol=1e-4)
    assert np.allclose(np.asarray(out32).sum(-1), 1.0, atol=1e-5)

    # bf16 MXU operands (default fast path): loose tolerance for bf16 rounding.
    out16 = jax.block_until_ready(fsmn_forward(params, x, cfg))
    assert out16.shape == (B, T, cfg["output_dim"])
    assert np.allclose(np.asarray(out16), np.asarray(ref), atol=1e-2, rtol=1e-1)
    assert np.allclose(np.asarray(out16).sum(-1), 1.0, atol=1e-5)

    print("KERNEL_OK")
</pallas_src>

<mosaic_0001>
module attributes {stable_mosaic.version = 11 : i64} {
  func.func @kernel(%arg0: i32, %arg1: memref<2x8x128xf32, #tpu.memory_space<vmem>>, %arg2: memref<6x128x128xf32, #tpu.memory_space<vmem>>, %arg3: memref<4x128xf32, #tpu.memory_space<vmem>>, %arg4: memref<2x5x128xf32, #tpu.memory_space<vmem>>, %arg5: memref<2x8x128xf32, #tpu.memory_space<vmem>>, %arg6: memref<2x12x128xf32, #tpu.memory_space<vmem>>) attributes {dimension_semantics = [#tpu.dimension_semantics<parallel>], iteration_bounds = array<i64: 1>, scalar_prefetch = 0 : i64, scratch_operands = 1 : i64, tpu.core_type = #tpu.core_type<tc>, window_params = [{transform_indices = @transform_0, window_bounds = array<i64: 2, 8, 128>}, {pipeline_mode = #tpu.pipeline_mode<synchronous>, transform_indices = @transform_1, window_bounds = array<i64: 6, 128, 128>}, {pipeline_mode = #tpu.pipeline_mode<synchronous>, transform_indices = @transform_2, window_bounds = array<i64: 4, 128>}, {pipeline_mode = #tpu.pipeline_mode<synchronous>, transform_indices = @transform_3, window_bounds = array<i64: 2, 5, 128>}, {transform_indices = @transform_4, window_bounds = array<i64: 2, 8, 128>}]} {
    %cst = arith.constant 0.000000e+00 : f32
    %0 = vector.broadcast %cst : f32 to vector<2x12x128xf32>
    %c0 = arith.constant 0 : index
    %c0_0 = arith.constant 0 : index
    %c0_1 = arith.constant 0 : index
    %1 = vector.load %arg6[%c0, %c0_0, %c0_1] : memref<2x12x128xf32, #tpu.memory_space<vmem>>, vector<2x12x128xf32>
    tpu.vector_store %arg6[%c0, %c0_0, %c0_1], %0 {strides = array<i32>} : memref<2x12x128xf32, #tpu.memory_space<vmem>>, vector<2x12x128xf32>,
    %c0_2 = arith.constant 0 : index
    %c0_3 = arith.constant 0 : index
    %c0_4 = arith.constant 0 : index
    %2 = vector.load %arg1[%c0_2, %c0_3, %c0_4] : memref<2x8x128xf32, #tpu.memory_space<vmem>>, vector<2x8x128xf32>
    %3 = vector.shape_cast %2 : vector<2x8x128xf32> to vector<16x128xf32>
    %c0_5 = arith.constant 0 : index
    %c0_6 = arith.constant 0 : index
    %c0_7 = arith.constant 0 : index
    %4 = vector.load %arg2[%c0_5, %c0_6, %c0_7] : memref<6x128x128xf32, #tpu.memory_space<vmem>>, vector<1x128x128xf32>
    %5 = vector.shape_cast %4 : vector<1x128x128xf32> to vector<128x128xf32>
    %cst_8 = arith.constant dense<0.000000e+00> : vector<16x128xf32>
    %6 = tpu.matmul %3, %5, %cst_8 {dimension_numbers = #tpu.dot_dimension_numbers<[1], [0], [0], [1], [0, 0, 1, 1], [], []>, precision = #tpu.contract_precision<fp32>} : vector<16x128xf32>, vector<128x128xf32>, vector<16x128xf32> -> vector<16x128xf32>
    %c0_9 = arith.constant 0 : index
    %c0_10 = arith.constant 0 : index
    %7 = vector.load %arg3[%c0_9, %c0_10] : memref<4x128xf32, #tpu.memory_space<vmem>>, vector<1x128xf32>
    %8 = vector.broadcast %7 : vector<1x128xf32> to vector<16x128xf32>
    %9 = arith.addf %6, %8 : vector<16x128xf32>
    %cst_11 = arith.constant 0.000000e+00 : f32
    %10 = vector.broadcast %cst_11 : f32 to vector<16x128xf32>
    %11 = arith.maximumf %9, %10 : vector<16x128xf32>
    %c1 = arith.constant 1 : index
    %c0_12 = arith.constant 0 : index
    %c0_13 = arith.constant 0 : index
    %12 = vector.load %arg2[%c1, %c0_12, %c0_13] : memref<6x128x128xf32, #tpu.memory_space<vmem>>, vector<1x128x128xf32>
    %13 = vector.shape_cast %12 : vector<1x128x128xf32> to vector<128x128xf32>
    %c2 = arith.constant 2 : index
    %c0_14 = arith.constant 0 : index
    %c0_15 = arith.constant 0 : index
    %14 = vector.load %arg2[%c2, %c0_14, %c0_15] : memref<6x128x128xf32, #tpu.memory_space<vmem>>, vector<1x128x128xf32>
    %15 = vector.shape_cast %14 : vector<1x128x128xf32> to vector<128x128xf32>
    %c1_16 = arith.constant 1 : index
    %c0_17 = arith.constant 0 : index
    %16 = vector.load %arg3[%c1_16, %c0_17] : memref<4x128xf32, #tpu.memory_space<vmem>>, vector<1x128xf32>
    %cst_18 = arith.constant dense<0.000000e+00> : vector<16x128xf32>
    %17 = tpu.matmul %11, %13, %cst_18 {dimension_numbers = #tpu.dot_dimension_numbers<[1], [0], [0], [1], [0, 0, 1, 1], [], []>, precision = #tpu.contract_precision<fp32>} : vector<16x128xf32>, vector<128x128xf32>, vector<16x128xf32> -> vector<16x128xf32>
    %18 = vector.shape_cast %17 : vector<16x128xf32> to vector<2x8x128xf32>
    %c0_19 = arith.constant 0 : index
    %c2_20 = arith.constant 2 : index
    %c0_21 = arith.constant 0 : index
    %19 = vector.load %arg6[%c0_19, %c2_20, %c0_21] : memref<2x12x128xf32, #tpu.memory_space<vmem>>, vector<2x8x128xf32>
    tpu.vector_store %arg6[%c0_19, %c2_20, %c0_21], %18 {strides = array<i32>} : memref<2x12x128xf32, #tpu.memory_space<vmem>>, vector<2x8x128xf32>,
    %cst_22 = arith.constant 0.000000e+00 : f32
    %20 = vector.broadcast %cst_22 : f32 to vector<2x8x128xf32>
    %c0_23 = arith.constant 0 : index
    %c0_24 = arith.constant 0 : index
    %c0_25 = arith.constant 0 : index
    %21 = vector.load %arg4[%c0_23, %c0_24, %c0_25] : memref<2x5x128xf32, #tpu.memory_space<vmem>>, vector<1x1x128xf32>
    %22 = vector.shape_cast %21 : vector<1x1x128xf32> to vector<1x128xf32>
    %23 = vector.shape_cast %22 : vector<1x128xf32> to vector<1x1x128xf32>
    %c0_26 = arith.constant 0 : index
    %c0_27 = arith.constant 0 : index
    %c0_28 = arith.constant 0 : index
    %24 = vector.load %arg6[%c0_26, %c0_27, %c0_28] : memref<2x12x128xf32, #tpu.memory_space<vmem>>, vector<2x8x128xf32>
    %25 = vector.broadcast %23 : vector<1x1x128xf32> to vector<2x8x128xf32>
    %26 = arith.mulf %25, %24 : vector<2x8x128xf32>
    %27 = arith.addf %20, %26 : vector<2x8x128xf32>
    %c0_29 = arith.constant 0 : index
    %c1_30 = arith.constant 1 : index
    %c0_31 = arith.constant 0 : index
    %28 = vector.load %arg4[%c0_29, %c1_30, %c0_31] : memref<2x5x128xf32, #tpu.memory_space<vmem>>, vector<1x1x128xf32>
    %29 = vector.shape_cast %28 : vector<1x1x128xf32> to vector<1x128xf32>
    %30 = vector.shape_cast %29 : vector<1x128xf32> to vector<1x1x128xf32>
    %c0_32 = arith.constant 0 : index
    %c1_33 = arith.constant 1 : index
    %c0_34 = arith.constant 0 : index
    %31 = vector.load %arg6[%c0_32, %c1_33, %c0_34] : memref<2x12x128xf32, #tpu.memory_space<vmem>>, vector<2x8x128xf32>
    %32 = vector.broadcast %30 : vector<1x1x128xf32> to vector<2x8x128xf32>
    %33 = arith.mulf %32, %31 : vector<2x8x128xf32>
    %34 = arith.addf %27, %33 : vector<2x8x128xf32>
    %c0_35 = arith.constant 0 : index
    %c2_36 = arith.constant 2 : index
    %c0_37 = arith.constant 0 : index
    %35 = vector.load %arg4[%c0_35, %c2_36, %c0_37] : memref<2x5x128xf32, #tpu.memory_space<vmem>>, vector<1x1x128xf32>
    %36 = vector.shape_cast %35 : vector<1x1x128xf32> to vector<1x128xf32>
    %37 = vector.shape_cast %36 : vector<1x128xf32> to vector<1x1x128xf32>
    %c0_38 = arith.constant 0 : index
    %c2_39 = arith.constant 2 : index
    %c0_40 = arith.constant 0 : index
    %38 = vector.load %arg6[%c0_38, %c2_39, %c0_40] : memref<2x12x128xf32, #tpu.memory_space<vmem>>, vector<2x8x128xf32>
    %39 = vector.broadcast %37 : vector<1x1x128xf32> to vector<2x8x128xf32>
    %40 = arith.mulf %39, %38 : vector<2x8x128xf32>
    %41 = arith.addf %34, %40 : vector<2x8x128xf32>
    %c0_41 = arith.constant 0 : index
    %c3 = arith.constant 3 : index
    %c0_42 = arith.constant 0 : index
    %42 = vector.load %arg4[%c0_41, %c3, %c0_42] : memref<2x5x128xf32, #tpu.memory_space<vmem>>, vector<1x1x128xf32>
    %43 = vector.shape_cast %42 : vector<1x1x128xf32> to vector<1x128xf32>
    %44 = vector.shape_cast %43 : vector<1x128xf32> to vector<1x1x128xf32>
    %c0_43 = arith.constant 0 : index
    %c3_44 = arith.constant 3 : index
    %c0_45 = arith.constant 0 : index
    %45 = vector.load %arg6[%c0_43, %c3_44, %c0_45] : memref<2x12x128xf32, #tpu.memory_space<vmem>>, vector<2x8x128xf32>
    %46 = vector.broadcast %44 : vector<1x1x128xf32> to vector<2x8x128xf32>
    %47 = arith.mulf %46, %45 : vector<2x8x128xf32>
    %48 = arith.addf %41, %47 : vector<2x8x128xf32>
    %c0_46 = arith.constant 0 : index
    %c4 = arith.constant 4 : index
    %c0_47 = arith.constant 0 : index
    %49 = vector.load %arg4[%c0_46, %c4, %c0_47] : memref<2x5x128xf32, #tpu.memory_space<vmem>>, vector<1x1x128xf32>
    %50 = vector.shape_cast %49 : vector<1x1x128xf32> to vector<1x128xf32>
    %51 = vector.shape_cast %50 : vector<1x128xf32> to vector<1x1x128xf32>
    %c0_48 = arith.constant 0 : index
    %c4_49 = arith.constant 4 : index
    %c0_50 = arith.constant 0 : index
    %52 = vector.load %arg6[%c0_48, %c4_49, %c0_50] : memref<2x12x128xf32, #tpu.memory_space<vmem>>, vector<2x8x128xf32>
    %53 = vector.broadcast %51 : vector<1x1x128xf32> to vector<2x8x128xf32>
    %54 = arith.mulf %53, %52 : vector<2x8x128xf32>
    %55 = arith.addf %48, %54 : vector<2x8x128xf32>
    %56 = vector.shape_cast %55 : vector<2x8x128xf32> to vector<16x128xf32>
    %cst_51 = arith.constant dense<0.000000e+00> : vector<16x128xf32>
    %57 = tpu.matmul %56, %15, %cst_51 {dimension_numbers = #tpu.dot_dimension_numbers<[1], [0], [0], [1], [0, 0, 1, 1], [], []>, precision = #tpu.contract_precision<fp32>} : vector<16x128xf32>, vector<128x128xf32>, vector<16x128xf32> -> vector<16x128xf32>
    %58 = vector.broadcast %16 : vector<1x128xf32> to vector<16x128xf32>
    %59 = arith.addf %57, %58 : vector<16x128xf32>
    %cst_52 = arith.constant 0.000000e+00 : f32
    %60 = vector.broadcast %cst_52 : f32 to vector<16x128xf32>
    %61 = arith.maximumf %59, %60 : vector<16x128xf32>
    %c3_53 = arith.constant 3 : index
    %c0_54 = arith.constant 0 : index
    %c0_55 = arith.constant 0 : index
    %62 = vector.load %arg2[%c3_53, %c0_54, %c0_55] : memref<6x128x128xf32, #tpu.memory_space<vmem>>, vector<1x128x128xf32>
    %63 = vector.shape_cast %62 : vector<1x128x128xf32> to vector<128x128xf32>
    %c4_56 = arith.constant 4 : index
    %c0_57 = arith.constant 0 : index
    %c0_58 = arith.constant 0 : index
    %64 = vector.load %arg2[%c4_56, %c0_57, %c0_58] : memref<6x128x128xf32, #tpu.memory_space<vmem>>, vector<1x128x128xf32>
    %65 = vector.shape_cast %64 : vector<1x128x128xf32> to vector<128x128xf32>
    %c2_59 = arith.constant 2 : index
    %c0_60 = arith.constant 0 : index
    %66 = vector.load %arg3[%c2_59, %c0_60] : memref<4x128xf32, #tpu.memory_space<vmem>>, vector<1x128xf32>
    %cst_61 = arith.constant dense<0.000000e+00> : vector<16x128xf32>
    %67 = tpu.matmul %61, %63, %cst_61 {dimension_numbers = #tpu.dot_dimension_numbers<[1], [0], [0], [1], [0, 0, 1, 1], [], []>, precision = #tpu.contract_precision<fp32>} : vector<16x128xf32>, vector<128x128xf32>, vector<16x128xf32> -> vector<16x128xf32>
    %68 = vector.shape_cast %67 : vector<16x128xf32> to vector<2x8x128xf32>
    %c0_62 = arith.constant 0 : index
    %c2_63 = arith.constant 2 : index
    %c0_64 = arith.constant 0 : index
    %69 = vector.load %arg6[%c0_62, %c2_63, %c0_64] : memref<2x12x128xf32, #tpu.memory_space<vmem>>, vector<2x8x128xf32>
    tpu.vector_store %arg6[%c0_62, %c2_63, %c0_64], %68 {strides = array<i32>} : memref<2x12x128xf32, #tpu.memory_space<vmem>>, vector<2x8x128xf32>,
    %cst_65 = arith.constant 0.000000e+00 : f32
    %70 = vector.broadcast %cst_65 : f32 to vector<2x8x128xf32>
    %c1_66 = arith.constant 1 : index
    %c0_67 = arith.constant 0 : index
    %c0_68 = arith.constant 0 : index
    %71 = vector.load %arg4[%c1_66, %c0_67, %c0_68] : memref<2x5x128xf32, #tpu.memory_space<vmem>>, vector<1x1x128xf32>
    %72 = vector.shape_cast %71 : vector<1x1x128xf32> to vector<1x128xf32>
    %73 = vector.shape_cast %72 : vector<1x128xf32> to vector<1x1x128xf32>
    %c0_69 = arith.constant 0 : index
    %c0_70 = arith.constant 0 : index
    %c0_71 = arith.constant 0 : index
    %74 = vector.load %arg6[%c0_69, %c0_70, %c0_71] : memref<2x12x128xf32, #tpu.memory_space<vmem>>, vector<2x8x128xf32>
    %75 = vector.broadcast %73 : vector<1x1x128xf32> to vector<2x8x128xf32>
    %76 = arith.mulf %75, %74 : vector<2x8x128xf32>
    %77 = arith.addf %70, %76 : vector<2x8x128xf32>
    %c1_72 = arith.constant 1 : index
    %c1_73 = arith.constant 1 : index
    %c0_74 = arith.constant 0 : index
    %78 = vector.load %arg4[%c1_72, %c1_73, %c0_74] : memref<2x5x128xf32, #tpu.memory_space<vmem>>, vector<1x1x128xf32>
    %79 = vector.shape_cast %78 : vector<1x1x128xf32> to vector<1x128xf32>
    %80 = vector.shape_cast %79 : vector<1x128xf32> to vector<1x1x128xf32>
    %c0_75 = arith.constant 0 : index
    %c1_76 = arith.constant 1 : index
    %c0_77 = arith.constant 0 : index
    %81 = vector.load %arg6[%c0_75, %c1_76, %c0_77] : memref<2x12x128xf32, #tpu.memory_space<vmem>>, vector<2x8x128xf32>
    %82 = vector.broadcast %80 : vector<1x1x128xf32> to vector<2x8x128xf32>
    %83 = arith.mulf %82, %81 : vector<2x8x128xf32>
    %84 = arith.addf %77, %83 : vector<2x8x128xf32>
    %c1_78 = arith.constant 1 : index
    %c2_79 = arith.constant 2 : index
    %c0_80 = arith.constant 0 : index
    %85 = vector.load %arg4[%c1_78, %c2_79, %c0_80] : memref<2x5x128xf32, #tpu.memory_space<vmem>>, vector<1x1x128xf32>
    %86 = vector.shape_cast %85 : vector<1x1x128xf32> to vector<1x128xf32>
    %87 = vector.shape_cast %86 : vector<1x128xf32> to vector<1x1x128xf32>
    %c0_81 = arith.constant 0 : index
    %c2_82 = arith.constant 2 : index
    %c0_83 = arith.constant 0 : index
    %88 = vector.load %arg6[%c0_81, %c2_82, %c0_83] : memref<2x12x128xf32, #tpu.memory_space<vmem>>, vector<2x8x128xf32>
    %89 = vector.broadcast %87 : vector<1x1x128xf32> to vector<2x8x128xf32>
    %90 = arith.mulf %89, %88 : vector<2x8x128xf32>
    %91 = arith.addf %84, %90 : vector<2x8x128xf32>
    %c1_84 = arith.constant 1 : index
    %c3_85 = arith.constant 3 : index
    %c0_86 = arith.constant 0 : index
    %92 = vector.load %arg4[%c1_84, %c3_85, %c0_86] : memref<2x5x128xf32, #tpu.memory_space<vmem>>, vector<1x1x128xf32>
    %93 = vector.shape_cast %92 : vector<1x1x128xf32> to vector<1x128xf32>
    %94 = vector.shape_cast %93 : vector<1x128xf32> to vector<1x1x128xf32>
    %c0_87 = arith.constant 0 : index
    %c3_88 = arith.constant 3 : index
    %c0_89 = arith.constant 0 : index
    %95 = vector.load %arg6[%c0_87, %c3_88, %c0_89] : memref<2x12x128xf32, #tpu.memory_space<vmem>>, vector<2x8x128xf32>
    %96 = vector.broadcast %94 : vector<1x1x128xf32> to vector<2x8x128xf32>
    %97 = arith.mulf %96, %95 : vector<2x8x128xf32>
    %98 = arith.addf %91, %97 : vector<2x8x128xf32>
    %c1_90 = arith.constant 1 : index
    %c4_91 = arith.constant 4 : index
    %c0_92 = arith.constant 0 : index
    %99 = vector.load %arg4[%c1_90, %c4_91, %c0_92] : memref<2x5x128xf32, #tpu.memory_space<vmem>>, vector<1x1x128xf32>
    %100 = vector.shape_cast %99 : vector<1x1x128xf32> to vector<1x128xf32>
    %101 = vector.shape_cast %100 : vector<1x128xf32> to vector<1x1x128xf32>
    %c0_93 = arith.constant 0 : index
    %c4_94 = arith.constant 4 : index
    %c0_95 = arith.constant 0 : index
    %102 = vector.load %arg6[%c0_93, %c4_94, %c0_95] : memref<2x12x128xf32, #tpu.memory_space<vmem>>, vector<2x8x128xf32>
    %103 = vector.broadcast %101 : vector<1x1x128xf32> to vector<2x8x128xf32>
    %104 = arith.mulf %103, %102 : vector<2x8x128xf32>
    %105 = arith.addf %98, %104 : vector<2x8x128xf32>
    %106 = vector.shape_cast %105 : vector<2x8x128xf32> to vector<16x128xf32>
    %cst_96 = arith.constant dense<0.000000e+00> : vector<16x128xf32>
    %107 = tpu.matmul %106, %65, %cst_96 {dimension_numbers = #tpu.dot_dimension_numbers<[1], [0], [0], [1], [0, 0, 1, 1], [], []>, precision = #tpu.contract_precision<fp32>} : vector<16x128xf32>, vector<128x128xf32>, vector<16x128xf32> -> vector<16x128xf32>
    %108 = vector.broadcast %66 : vector<1x128xf32> to vector<16x128xf32>
    %109 = arith.addf %107, %108 : vector<16x128xf32>
    %cst_97 = arith.constant 0.000000e+00 : f32
    %110 = vector.broadcast %cst_97 : f32 to vector<16x128xf32>
    %111 = arith.maximumf %109, %110 : vector<16x128xf32>
    %c5 = arith.constant 5 : index
    %c0_98 = arith.constant 0 : index
    %c0_99 = arith.constant 0 : index
    %112 = vector.load %arg2[%c5, %c0_98, %c0_99] : memref<6x128x128xf32, #tpu.memory_space<vmem>>, vector<1x128x128xf32>
    %113 = vector.shape_cast %112 : vector<1x128x128xf32> to vector<128x128xf32>
    %cst_100 = arith.constant dense<0.000000e+00> : vector<16x128xf32>
    %114 = tpu.matmul %111, %113, %cst_100 {dimension_numbers = #tpu.dot_dimension_numbers<[1], [0], [0], [1], [0, 0, 1, 1], [], []>, precision = #tpu.contract_precision<fp32>} : vector<16x128xf32>, vector<128x128xf32>, vector<16x128xf32> -> vector<16x128xf32>
    %c3_101 = arith.constant 3 : index
    %c0_102 = arith.constant 0 : index
    %115 = vector.load %arg3[%c3_101, %c0_102] : memref<4x128xf32, #tpu.memory_space<vmem>>, vector<1x128xf32>
    %116 = vector.broadcast %115 : vector<1x128xf32> to vector<16x128xf32>
    %117 = arith.addf %114, %116 : vector<16x128xf32>
    %118 = tpu.iota {dimensions = array<i32: 1>} : vector<16x128xi32>
    %c16_i32 = arith.constant 16 : i32
    %119 = vector.broadcast %c16_i32 : i32 to vector<16x128xi32>
    %120 = arith.cmpi slt, %118, %119 : vector<16x128xi32>
    %cst_103 = arith.constant -1.000000e+30 : f32
    %121 = vector.broadcast %cst_103 : f32 to vector<16x128xf32>
    %122 = arith.select %120, %117, %121 : vector<16x128xi1>, vector<16x128xf32>
    %cst_104 = arith.constant dense<0xFF800000> : vector<16xf32>
    %123 = vector.multi_reduction <maximumf>, %122, %cst_104 [1] : vector<16x128xf32> to vector<16xf32>
    %124 = vector.shape_cast %123 : vector<16xf32> to vector<16x1xf32>
    %125 = vector.broadcast %124 : vector<16x1xf32> to vector<16x128xf32>
    %126 = arith.subf %122, %125 : vector<16x128xf32>
    %127 = math.exp %126 : vector<16x128xf32>
    %cst_105 = arith.constant dense<0.000000e+00> : vector<16xf32>
    %128 = vector.multi_reduction <add>, %127, %cst_105 [1] : vector<16x128xf32> to vector<16xf32>
    %129 = vector.shape_cast %128 : vector<16xf32> to vector<16x1xf32>
    %130 = tpu.reciprocal %129 : vector<16x1xf32> -> vector<16x1xf32>
    %131 = vector.broadcast %130 : vector<16x1xf32> to vector<16x128xf32>
    %132 = arith.mulf %127, %131 : vector<16x128xf32>
    %133 = vector.shape_cast %132 : vector<16x128xf32> to vector<2x8x128xf32>
    %c0_106 = arith.constant 0 : index
    %c0_107 = arith.constant 0 : index
    %c0_108 = arith.constant 0 : index
    %134 = vector.load %arg5[%c0_106, %c0_107, %c0_108] : memref<2x8x128xf32, #tpu.memory_space<vmem>>, vector<2x8x128xf32>
    tpu.vector_store %arg5[%c0_106, %c0_107, %c0_108], %133 {strides = array<i32>} : memref<2x8x128xf32, #tpu.memory_space<vmem>>, vector<2x8x128xf32>,
    return
  }
  func.func @transform_0(%arg0: i32) -> (i32, i32, i32) {
    %c0_i32 = arith.constant 0 : i32
    %c0_i32_0 = arith.constant 0 : i32
    %c0_i32_1 = arith.constant 0 : i32
    return %arg0, %c0_i32, %c0_i32_0 : i32, i32, i32
  }
  func.func @transform_1(%arg0: i32) -> (i32, i32, i32) {
    %c0_i32 = arith.constant 0 : i32
    %c0_i32_0 = arith.constant 0 : i32
    %c0_i32_1 = arith.constant 0 : i32
    %c0_i32_2 = arith.constant 0 : i32
    return %c0_i32, %c0_i32_0, %c0_i32_1 : i32, i32, i32
  }
  func.func @transform_2(%arg0: i32) -> (i32, i32) {
    %c0_i32 = arith.constant 0 : i32
    %c0_i32_0 = arith.constant 0 : i32
    %c0_i32_1 = arith.constant 0 : i32
    return %c0_i32, %c0_i32_0 : i32, i32
  }
  func.func @transform_3(%arg0: i32) -> (i32, i32, i32) {
    %c0_i32 = arith.constant 0 : i32
    %c0_i32_0 = arith.constant 0 : i32
    %c0_i32_1 = arith.constant 0 : i32
    %c0_i32_2 = arith.constant 0 : i32
    return %c0_i32, %c0_i32_0, %c0_i32_1 : i32, i32, i32
  }
  func.func @transform_4(%arg0: i32) -> (i32, i32, i32) {
    %c0_i32 = arith.constant 0 : i32
    %c0_i32_0 = arith.constant 0 : i32
    %c0_i32_1 = arith.constant 0 : i32
    return %arg0, %c0_i32, %c0_i32_0 : i32, i32, i32
  }
}

</mosaic_0001>

<bundles_post_ra>
// kernel: tpu_custom_call.1
= control target key start
LH: loop header
LB: loop body
LE: loop exit
PB: predicated region body
PF: predicated region fallthrough
CT: control target
= control target key end

     0   :  { %9 = vsyncpa [#allocation4], 0  ;;  %s4045_s0 = inlined_call_operand.vmem [shape: f32[2,8,128], index: 0, kind: input, shape index: {}]   ;;  %s4046_s1 = inlined_call_operand.hbm [shape: f32[6,128,128], index: 1, kind: input, shape index: {}]   ;;  %s4047_s2 = inlined_call_operand.vmem [shape: f32[4,128], index: 2, kind: input, shape index: {}]   ;;  %s4048_s3 = inlined_call_operand.vmem [shape: f32[2,5,128], index: 3, kind: input, shape index: {}]   ;;  %s4049_s4 = inlined_call_operand.hbm [shape: f32[2,8,128], index: 4, kind: output, shape index: {}]  }
   0x1   :  { %10 = vsyncpa [#allocation5], 0  ;;  %s17_s17 = sshll.u32 %s4046_s1, 4  ;;  %s2626_s18 = smov [#allocation3]   ;;  %s18_s17 = int_to_ptr.hbm [resolvable:$true] %s17_s17 }
   0x2   :  { %s19_s19 = sshll.u32 %s2626_s18, 4  ;;  %s2627_s20 = smov 128   ;;  %s20_s19 = int_to_ptr.vmem [resolvable:$true] %s19_s19 }
   0x3   :  { %s2628_s21 = smov 8  }
   0x4   :  { %25 = dma.hbm_to_vmem [thread:$0]  %s18_s17, 12288, %s20_s19, [#allocation4], %s2627_s20, %s2627_s20, %s2628_s21  }
   0x5   :  { %2622 = dma.done.wait [#allocation4], 12288  }
   0x6   :  { %2623 = vsyncadd [#allocation4], 4294955008  ;;  %v55_v0 = vld [vmem:[#allocation3 + $0x78] sm:$0xff]  ;;  %v54_v1 = vld [vmem:[#allocation3 + $0x70] sm:$0xff]  ;;  %s2529_s28 = sshll.u32 %s4049_s4, 4  ;;  %s2530_s28 = int_to_ptr.hbm [resolvable:$true] %s2529_s28 }
   0x7   :  { %v53_v2 = vld [vmem:[#allocation3 + $0x68] sm:$0xff]  ;;  %v2662_v3 = vand.u32 4294901760, %v55_v0  ;;  %v2664_v4 = vand.u32 4294901760, %v54_v1  ;;  %v52_v6 = vld [vmem:[#allocation3 + $0x60] sm:$0xff]  ;;  %v51_v7 = vld [vmem:[#allocation3 + $0x58] sm:$0xff] }
   0x8   :  { %v2666_v5 = vand.u32 4294901760, %v53_v2  ;;  %v50_v8 = vld [vmem:[#allocation3 + $0x50] sm:$0xff]  ;;  %v2668_v9 = vand.u32 4294901760, %v52_v6  ;;  %v2670_v10 = vand.u32 4294901760, %v51_v7  ;;  %v49_v12 = vld [vmem:[#allocation3 + $0x48] sm:$0xff]  ;;  %v48_v13 = vld [vmem:[#allocation3 + $0x40] sm:$0xff] }
   0x9   :  { %v2672_v11 = vand.u32 4294901760, %v50_v8  ;;  %59 = vmatpush.msra.mxu0 %v2662_v3  ;;  %v2676_v14 = vsub.f32 %v55_v0, %v2662_v3  ;;  %v2679_v15 = vsub.f32 %v54_v1, %v2664_v4  ;;  %v2681_v16 = vand.u32 4294901760, %v49_v12  ;;  %v47_v18 = vld [vmem:[#allocation3 + $0x38] sm:$0xff]  ;;  %272 = vmatpush.msra.mxu3 %v2662_v3  ;;  %v46_v25 = vld [vmem:[#allocation3 + $0x30] sm:$0xff]  ;;  %v45_v30 = vld [vmem:[#allocation3 + $0x28] sm:$0xff] }
   0xa   :  { %v2684_v17 = vsub.f32 %v53_v2, %v2666_v5  ;;  %v2688_v19 = vsub.f32 %v52_v6, %v2668_v9  ;;  %v2691_v20 = vsub.f32 %v51_v7, %v2670_v10  ;;  %v2697_v24 = vand.u32 4294901760, %v48_v13  ;;  %v44_v40 = vld [vmem:[#allocation3 + $0x20] sm:$0xff]  ;;  %v43_v43 = vld [vmem:[#allocation3 + $0x18] sm:$0xff]  ;;  %v42_v52 = vld [vmem:[#allocation3 + $0x10] sm:$0xff] }
   0xb   :  { %61 = vmatpush.msra.mxu0 %v2664_v4  ;;  %v109_v21 = vand.u32 4294901760, %v2676_v14  ;;  %v115_v22 = vand.u32 4294901760, %v2679_v15  ;;  %214 = vmatpush.msra.mxu2 %v2676_v14  ;;  %v2701_v27 = vand.u32 4294901760, %v47_v18  ;;  %v2705_v29 = vsub.f32 %v50_v8, %v2672_v11  ;;  %v41_v58 = vld [vmem:[#allocation3 + $0x8] sm:$0xff]  ;;  %v38_v61 = vld [vmem:[%s4045_s0] sm:$0xff] }
   0xc   :  { %v121_v23 = vand.u32 4294901760, %v2684_v17  ;;  %v127_v26 = vand.u32 4294901760, %v2688_v19  ;;  %v133_v28 = vand.u32 4294901760, %v2691_v20  ;;  %274 = vmatpush.msra.mxu3 %v2664_v4  ;;  %v2719_v34 = vsub.f32 %v49_v12, %v2681_v16  ;;  %v40_v1 = vld [vmem:[#allocation3] sm:$0xff] }
   0xd   :  { %63 = vmatpush.msra.mxu0 %v2666_v5  ;;  %v110_v31 = vsub.f32 %v2676_v14, %v109_v21  ;;  %v116_v32 = vsub.f32 %v2679_v15, %v115_v22  ;;  %v2721_v35 = vand.u32 4294901760, %v46_v25  ;;  %217 = vmatpush.msra.mxu2 %v2679_v15  ;;  %v139_v39 = vand.u32 4294901760, %v2705_v29  ;;  %v447_v15 = vld [vmem:[#allocation3 + $0xf0] sm:$0xff] }
   0xe   :  { %v122_v33 = vsub.f32 %v2684_v17, %v121_v23  ;;  %276 = vmatpush.msra.mxu3 %v2666_v5  ;;  %v128_v38 = vsub.f32 %v2688_v19, %v127_v26  ;;  %v2730_v41 = vand.u32 4294901760, %v45_v30  ;;  %v2733_v42 = vsub.f32 %v48_v13, %v2697_v24 }
   0xf   :  { %65 = vmatpush.msra.mxu0 %v2668_v9  ;;  %v111_v36 = vand.u32 4294901760, %v110_v31  ;;  %v117_v37 = vand.u32 4294901760, %v116_v32  ;;  %220 = vmatpush.msra.mxu2 %v2684_v17  ;;  %v134_v45 = vsub.f32 %v2691_v20, %v133_v28  ;;  %v145_v46 = vand.u32 4294901760, %v2719_v34  ;;  %v39_v31 = vld [vmem:[%s4045_s0 + $0x8] sm:$0xff] }
  0x10   :  { %278 = vmatpush.msra.mxu3 %v2668_v9  ;;  %v123_v44 = vand.u32 4294901760, %v122_v33  ;;  %v2743_v47 = vsub.f32 %v47_v18, %v2701_v27  ;;  %v2745_v48 = vand.u32 4294901760, %v44_v40  ;;  %v129_v49 = vand.u32 4294901760, %v128_v38  ;;  %v446_v17 = vld [vmem:[#allocation3 + $0xe8] sm:$0xff] }
  0x11   :  { %67 = vmatpush.msra.mxu0 %v2670_v10  ;;  %112 = vmatpush.msra.mxu1 %v111_v36  ;;  %v140_v50 = vsub.f32 %v2705_v29, %v139_v39  ;;  %v151_v51 = vand.u32 4294901760, %v2733_v42  ;;  %v2755_v53 = vsub.f32 %v46_v25, %v2721_v35  ;;  %v2757_v54 = vand.u32 4294901760, %v43_v43 }
  0x12   :  { %223 = vmatpush.msra.mxu2 %v2688_v19  ;;  %280 = vmatpush.msra.mxu3 %v2670_v10  ;;  %v135_v55 = vand.u32 4294901760, %v134_v45  ;;  %v146_v56 = vsub.f32 %v2719_v34, %v145_v46  ;;  %v157_v57 = vand.u32 4294901760, %v2743_v47  ;;  %v2767_v59 = vsub.f32 %v45_v30, %v2730_v41 }
  0x13   :  { %69 = vmatpush.msra.mxu0 %v2672_v11  ;;  %118 = vmatpush.msra.mxu1 %v117_v37  ;;  %v2769_v60 = vand.u32 4294901760, %v42_v52  ;;  %v141_v62 = vand.u32 4294901760, %v140_v50  ;;  %v152_v63 = vsub.f32 %v2733_v42, %v151_v51  ;;  %v163_v0 = vand.u32 4294901760, %v2755_v53 }
  0x14   :  { %226 = vmatpush.msra.mxu2 %v2691_v20  ;;  %282 = vmatpush.msra.mxu3 %v2672_v11  ;;  %v2782_v2 = vsub.f32 %v44_v40, %v2745_v48  ;;  %v2784_v6 = vand.u32 4294901760, %v41_v58  ;;  %v2788_v7 = vsub.f32 %v43_v43, %v2757_v54  ;;  %v147_v8 = vand.u32 4294901760, %v146_v56 }
  0x15   :  { %71 = vmatpush.msra.mxu0 %v2681_v16  ;;  %124 = vmatpush.msra.mxu1 %v123_v44  ;;  %v158_v12 = vsub.f32 %v2743_v47, %v157_v57  ;;  %v169_v13 = vand.u32 4294901760, %v2767_v59  ;;  %v2796_v18 = vand.u32 4294901760, %v38_v61  ;;  %v2798_v25 = vand.u32 4294901760, %v40_v1 }
  0x16   :  { %229 = vmatpush.msra.mxu2 %v2705_v29  ;;  %284 = vmatpush.msra.mxu3 %v2681_v16  ;;  %v2802_v30 = vsub.f32 %v42_v52, %v2769_v60  ;;  %v153_v32 = vand.u32 4294901760, %v152_v63  ;;  %v164_v33 = vsub.f32 %v2755_v53, %v163_v0  ;;  %v175_v36 = vand.u32 4294901760, %v2782_v2 }
  0x17   :  { %73 = vmatpush.msra.mxu0 %v2697_v24  ;;  %130 = vmatpush.msra.mxu1 %v129_v49  ;;  %v2814_v37 = vsub.f32 %v38_v61, %v2796_v18  ;;  %v181_v38 = vand.u32 4294901760, %v2788_v7  ;;  %v2819_v40 = vsub.f32 %v41_v58, %v2784_v6  ;;  %v159_v43 = vand.u32 4294901760, %v158_v12 }
  0x18   :  { %232 = vmatpush.msra.mxu2 %v2719_v34  ;;  %286 = vmatpush.msra.mxu3 %v2697_v24  ;;  %v170_v44 = vsub.f32 %v2767_v59, %v169_v13  ;;  %v2827_v49 = vand.u32 4294901760, %v39_v31  ;;  %v165_v50 = vand.u32 4294901760, %v164_v33  ;;  %v176_v52 = vsub.f32 %v2782_v2, %v175_v36 }
  0x19   :  { %75 = vmatpush.msra.mxu0 %v2701_v27  ;;  %136 = vmatpush.msra.mxu1 %v135_v55  ;;  %v92_v45 = vand.u32 4294901760, %v2814_v37  ;;  %v187_v55 = vand.u32 4294901760, %v2802_v30  ;;  %v2837_v56 = vsub.f32 %v40_v1, %v2798_v25  ;;  %v193_v58 = vand.u32 4294901760, %v2819_v40 }
  0x1a   :  { %235 = vmatpush.msra.mxu2 %v2733_v42  ;;  %288 = vmatpush.msra.mxu3 %v2701_v27  ;;  %v171_v61 = vand.u32 4294901760, %v170_v44  ;;  %v177_v1 = vand.u32 4294901760, %v176_v52  ;;  %v2897_v19 = vand.u32 4294901760, %v447_v15  ;;  %v2899_v20 = vand.u32 4294901760, %v446_v17 }
  0x1b   :  { %77 = vmatpush.msra.mxu0 %v2721_v35  ;;  %142 = vmatpush.msra.mxu1 %v141_v62  ;;  %v182_v62 = vsub.f32 %v2788_v7, %v181_v38  ;;  %v93_v63 = vsub.f32 %v2814_v37, %v92_v45  ;;  %v188_v12 = vsub.f32 %v2802_v30, %v187_v55 }
  0x1c   :  { %238 = vmatpush.msra.mxu2 %v2743_v47  ;;  %290 = vmatpush.msra.mxu3 %v2721_v35  ;;  %v194_v33 = vsub.f32 %v2819_v40, %v193_v58  ;;  %v2915_v29 = vsub.f32 %v447_v15, %v2897_v19  ;;  %v2918_v34 = vsub.f32 %v446_v17, %v2899_v20 }
  0x1d   :  { %79 = vmatpush.msra.mxu0 %v2730_v41  ;;  %148 = vmatpush.msra.mxu1 %v147_v8  ;;  %v99_v8 = vsub.f32 %v39_v31, %v2827_v49  ;;  %v183_v31 = vand.u32 4294901760, %v182_v62 }
  0x1e   :  { %241 = vmatpush.msra.mxu2 %v2755_v53  ;;  %292 = vmatpush.msra.mxu3 %v2730_v41  ;;  %v524_v47 = vand.u32 4294901760, %v2915_v29 }
  0x1f   :  { %81 = vmatpush.msra.mxu0 %v2745_v48  ;;  %154 = vmatpush.msra.mxu1 %v153_v32  ;;  %v199_v32 = vand.u32 4294901760, %v2837_v56  ;;  %v100_v44 = vand.u32 4294901760, %v99_v8 }
  0x20   :  { %244 = vmatpush.msra.mxu2 %v2767_v59  ;;  %294 = vmatpush.msra.mxu3 %v2745_v48  ;;  %v525_v59 = vsub.f32 %v2915_v29, %v524_v47 }
  0x21   :  { %83 = vmatpush.msra.mxu0 %v2757_v54  ;;  %160 = vmatpush.msra.mxu1 %v159_v43  ;;  %v94_v43 = vand.u32 4294901760, %v93_v63  ;;  %v200_v52 = vsub.f32 %v2837_v56, %v199_v32  ;;  %v101_v62 = vsub.f32 %v99_v8, %v100_v44 }
  0x22   :  { %247 = vmatpush.msra.mxu2 %v2782_v2  ;;  %296 = vmatpush.msra.mxu3 %v2757_v54 }
  0x23   :  { %85 = vmatpush.msra.mxu0 %v2769_v60  ;;  %166 = vmatpush.msra.mxu1 %v165_v50  ;;  %v189_v50 = vand.u32 4294901760, %v188_v12  ;;  %v201_v63 = vand.u32 4294901760, %v200_v52  ;;  %v102_v14 = vand.u32 4294901760, %v101_v62 }
  0x24   :  { %250 = vmatpush.msra.mxu2 %v2788_v7  ;;  %298 = vmatpush.msra.mxu3 %v2769_v60 }
  0x25   :  { %87 = vmatpush.msra.mxu0 %v2784_v6  ;;  %172 = vmatpush.msra.mxu1 %v171_v61  ;;  %v195_v61 = vand.u32 4294901760, %v194_v33 }
  0x26   :  { %253 = vmatpush.msra.mxu2 %v2802_v30  ;;  %300 = vmatpush.msra.mxu3 %v2784_v6 }
  0x27   :  { %89 = vmatpush.msra.mxu0 %v2798_v25  ;;  %178 = vmatpush.msra.mxu1 %v177_v1 }
  0x28   :  { %256 = vmatpush.msra.mxu2 %v2819_v40  ;;  %95 = vmatmul.f32.vlgmr.msra.gmra.mxu0 %v94_v43 }
  0x29   :  { %319 = vmatpush.msrb.mxu0 %v109_v21  ;;  %184 = vmatpush.msra.mxu1 %v183_v31  ;;  %v444_v21 = vld [vmem:[#allocation3 + $0xd8] sm:$0xff] }
  0x2a   :  { %259 = vmatpush.msra.mxu2 %v2837_v56  ;;  %302 = vmatpush.msra.mxu3 %v2798_v25 }
  0x2b   :  { %323 = vmatpush.msrb.mxu0 %v115_v22  ;;  %190 = vmatpush.msra.mxu1 %v189_v50  ;;  %v443_v22 = vld [vmem:[#allocation3 + $0xd0] sm:$0xff] }
  0x2c   :  { %262 = vmatmul.f32.vlgmr.msra.gmra.mxu2 %v2814_v37  ;;  %306 = vmatmul.f32.vlgmr.msra.gmra.mxu3 %v92_v45 }
  0x2d   :  { %327 = vmatpush.msrb.mxu0 %v121_v23  ;;  %196 = vmatpush.msra.mxu1 %v195_v61  ;;  %v2904_v23 = vand.u32 4294901760, %v444_v21 }
  0x2f   :  { %331 = vmatpush.msrb.mxu0 %v127_v26  ;;  %202 = vmatpush.msra.mxu1 %v201_v63  ;;  %v2906_v26 = vand.u32 4294901760, %v443_v22  ;;  %v2925_v42 = vsub.f32 %v444_v21, %v2904_v23  ;;  %v436_v21 = vld [vmem:[#allocation3 + $0x98] sm:$0xff] }
  0x30   :  { %103 = vmatmul.f32.gmra.mxu0 %v102_v14  ;;  %204 = vmatmul.f32.vlgmr.msra.gmra.mxu1 %v2796_v18 }
  0x31   :  { %335 = vmatpush.msrb.mxu0 %v133_v28  ;;  %390 = vmatpush.msrb.mxu1 %v2662_v3  ;;  %v448_v3 = vld [vmem:[#allocation3 + $0xf8] sm:$0xff]  ;;  %v442_v28 = vld [vmem:[#allocation3 + $0xc8] sm:$0xff]  ;;  %v542_v45 = vand.u32 4294901760, %v2925_v42 }
  0x32   :  { %v2933_v53 = vand.u32 4294901760, %v442_v28 }
  0x33   :  { %339 = vmatpush.msrb.mxu0 %v139_v39  ;;  %392 = vmatpush.msrb.mxu1 %v2664_v4  ;;  %v2895_v4 = vand.u32 4294901760, %v448_v3 }
  0x34   :  { %267 = vmatmul.f32.gmra.mxu2 %v99_v8  ;;  %312 = vmatmul.f32.gmra.mxu3 %v100_v44  ;;  %v2960_v2 = vsub.f32 %v442_v28, %v2933_v53 }
  0x35   :  { %343 = vmatpush.msrb.mxu0 %v145_v46  ;;  %394 = vmatpush.msrb.mxu1 %v2666_v5  ;;  %v445_v5 = vld [vmem:[#allocation3 + $0xe0] sm:$0xff] }
  0x36   :  { %468 = vmatpush.msrb.mxu2 %v2895_v4  ;;  %v441_v46 = vld [vmem:[#allocation3 + $0xc0] sm:$0xff]  ;;  %v554_v30 = vand.u32 4294901760, %v2960_v2 }
  0x37   :  { %347 = vmatpush.msrb.mxu0 %v151_v51  ;;  %396 = vmatpush.msrb.mxu1 %v2668_v9  ;;  %v2902_v9 = vand.u32 4294901760, %v445_v5  ;;  %v530_v51 = vand.u32 4294901760, %v2918_v34 }
  0x38   :  { %208 = vmatmul.f32.gmra.mxu1 %v2827_v49  ;;  %470 = vmatpush.msrb.mxu2 %v2897_v19 }
  0x39   :  { %351 = vmatpush.msrb.mxu0 %v157_v57  ;;  %398 = vmatpush.msrb.mxu1 %v2670_v10  ;;  %v2912_v10 = vsub.f32 %v448_v3, %v2895_v4  ;;  %v2921_v39 = vsub.f32 %v445_v5, %v2902_v9  ;;  %v531_v37 = vsub.f32 %v2918_v34, %v530_v51 }
  0x3a   :  { %472 = vmatpush.msrb.mxu2 %v2899_v20 }
  0x3b   :  { %355 = vmatpush.msrb.mxu0 %v163_v0  ;;  %400 = vmatpush.msrb.mxu1 %v2672_v11  ;;  %v518_v11 = vand.u32 4294901760, %v2912_v10  ;;  %v536_v57 = vand.u32 4294901760, %v2921_v39  ;;  %v2938_v0 = vsub.f32 %v443_v22, %v2906_v26  ;;  %v532_v7 = vand.u32 4294901760, %v531_v37 }
  0x3c   :  { %474 = vmatpush.msrb.mxu2 %v2902_v9 }
  0x3d   :  { %359 = vmatpush.msrb.mxu0 %v169_v13  ;;  %402 = vmatpush.msrb.mxu1 %v2681_v16  ;;  %v519_v16 = vsub.f32 %v2912_v10, %v518_v11  ;;  %v2949_v13 = vand.u32 4294901760, %v441_v46  ;;  %v537_v8 = vsub.f32 %v2921_v39, %v536_v57  ;;  %v548_v1 = vand.u32 4294901760, %v2938_v0 }
  0x3e   :  { %476 = vmatpush.msrb.mxu2 %v2904_v23 }
  0x3f   :  { %363 = vmatpush.msrb.mxu0 %v175_v36  ;;  %404 = vmatpush.msrb.mxu1 %v2697_v24  ;;  %v520_v24 = vand.u32 4294901760, %v519_v16  ;;  %v526_v36 = vand.u32 4294901760, %v525_v59  ;;  %v435_v16 = vld [vmem:[#allocation3 + $0x90] sm:$0xff] }
  0x40   :  { %478 = vmatpush.msrb.mxu2 %v2906_v26 }
  0x41   :  { %367 = vmatpush.msrb.mxu0 %v181_v38  ;;  %406 = vmatpush.msrb.mxu1 %v2701_v27  ;;  %v2971_v27 = vsub.f32 %v441_v46, %v2949_v13  ;;  %v543_v38 = vsub.f32 %v2925_v42, %v542_v45  ;;  %v3065_v46 = vand.u32 4294901760, %v436_v21 }
  0x42   :  { %521 = vmatpush.msrb.mxu3 %v520_v24  ;;  %480 = vmatpush.msrb.mxu2 %v2933_v53  ;;  %v3073_v24 = vand.u32 4294901760, %v435_v16 }
  0x43   :  { %371 = vmatpush.msrb.mxu0 %v187_v55  ;;  %408 = vmatpush.msrb.mxu1 %v2721_v35  ;;  %v538_v35 = vand.u32 4294901760, %v537_v8  ;;  %v549_v55 = vsub.f32 %v2938_v0, %v548_v1  ;;  %v560_v40 = vand.u32 4294901760, %v2971_v27  ;;  %v3071_v37 = vsub.f32 %v436_v21, %v3065_v46  ;;  %v434_v8 = vld [vmem:[#allocation3 + $0x88] sm:$0xff] }
  0x44   :  { %527 = vmatpush.msrb.mxu3 %v526_v36  ;;  %482 = vmatpush.msrb.mxu2 %v2949_v13 }
  0x45   :  { %375 = vmatpush.msrb.mxu0 %v193_v58  ;;  %410 = vmatpush.msrb.mxu1 %v2730_v41  ;;  %v544_v41 = vand.u32 4294901760, %v543_v38  ;;  %v555_v58 = vsub.f32 %v2960_v2, %v554_v30  ;;  %v550_v12 = vand.u32 4294901760, %v549_v55  ;;  %v590_v38 = vand.u32 4294901760, %v3071_v37 }
  0x46   :  { %533 = vmatpush.msrb.mxu3 %v532_v7  ;;  %v433_v7 = vld [vmem:[#allocation3 + $0x80] sm:$0xff]  ;;  %v3080_v55 = vand.u32 4294901760, %v434_v8 }
  0x47   :  { %379 = vmatpush.msrb.mxu0 %v199_v32  ;;  %412 = vmatpush.msrb.mxu1 %v2745_v48  ;;  %v561_v48 = vsub.f32 %v2971_v27, %v560_v40 }
  0x48   :  { %381 = vmatmul.f32.vlgmr.msrb.gmra.mxu0 %v2796_v18  ;;  %539 = vmatpush.msrb.mxu3 %v538_v35  ;;  %v595_v35 = vsub.f32 %v435_v16, %v3073_v24 }
  0x49   :  { %414 = vmatpush.msrb.mxu1 %v2757_v54  ;;  %623 = vmatpush.msra.mxu0 %v2912_v10  ;;  %v556_v54 = vand.u32 4294901760, %v555_v58  ;;  %v562_v56 = vand.u32 4294901760, %v561_v48  ;;  %v591_v58 = vsub.f32 %v3071_v37, %v590_v38  ;;  %v601_v48 = vsub.f32 %v434_v8, %v3080_v55 }
  0x4a   :  { %545 = vmatpush.msrb.mxu3 %v544_v41  ;;  %v3082_v41 = vand.u32 4294901760, %v433_v7 }
  0x4b   :  { %416 = vmatpush.msrb.mxu1 %v2769_v60  ;;  %626 = vmatpush.msra.mxu0 %v2915_v29  ;;  %v440_v60 = vld [vmem:[#allocation3 + $0xb8] sm:$0xff] }
  0x4c   :  { %551 = vmatpush.msrb.mxu3 %v550_v12  ;;  %v596_v12 = vand.u32 4294901760, %v595_v35 }
  0x4d   :  { %418 = vmatpush.msrb.mxu1 %v2784_v6  ;;  %629 = vmatpush.msra.mxu0 %v2918_v34  ;;  %v439_v6 = vld [vmem:[#allocation3 + $0xb0] sm:$0xff] }
  0x4e   :  { %557 = vmatpush.msrb.mxu3 %v556_v54  ;;  %v3023_v32 = vand.u32 4294901760, %v439_v6  ;;  %v607_v54 = vsub.f32 %v433_v7, %v3082_v41  ;;  %v462_v7 = vld [vmem:[#allocation3 + $0x160] sm:$0xff] }
  0x4f   :  { %420 = vmatpush.msrb.mxu1 %v2798_v25  ;;  %632 = vmatpush.msra.mxu0 %v2921_v39  ;;  %v3021_v25 = vand.u32 4294901760, %v440_v60 }
  0x50   :  { %385 = vmatmul.f32.gmra.mxu0 %v2827_v49  ;;  %422 = vmatmul.f32.vlgmr.msrb.gmra.mxu1 %v2796_v18  ;;  %v438_v18 = vld [vmem:[#allocation3 + $0xa8] sm:$0xff]  ;;  %v3033_v44 = vsub.f32 %v439_v6, %v3023_v32  ;;  %v602_v6 = vand.u32 4294901760, %v601_v48 }
  0x51   :  { %681 = vmatpush.msra.mxu1 %v2895_v4  ;;  %635 = vmatpush.msra.mxu0 %v2925_v42  ;;  %v3025_v31 = vand.u32 4294901760, %v438_v18  ;;  %v3030_v43 = vsub.f32 %v440_v60, %v3021_v25  ;;  %v597_v60 = vsub.f32 %v595_v35, %v596_v12 }
  0x52   :  { %563 = vmatpush.msrb.mxu3 %v562_v56  ;;  %484 = vmatpush.msrb.mxu2 %v3021_v25  ;;  %v572_v62 = vand.u32 4294901760, %v3033_v44  ;;  %v592_v56 = vand.u32 4294901760, %v591_v58  ;;  %v461_v58 = vld [vmem:[#allocation3 + $0x158] sm:$0xff] }
  0x53   :  { %683 = vmatpush.msra.mxu1 %v2897_v19  ;;  %638 = vmatpush.msra.mxu0 %v2938_v0  ;;  %v3036_v50 = vsub.f32 %v438_v18, %v3025_v31  ;;  %v566_v61 = vand.u32 4294901760, %v3030_v43  ;;  %v608_v18 = vand.u32 4294901760, %v607_v54 }
  0x54   :  { %486 = vmatpush.msrb.mxu2 %v3023_v32  ;;  %v573_v15 = vsub.f32 %v3033_v44, %v572_v62 }
  0x55   :  { %685 = vmatpush.msra.mxu1 %v2899_v20  ;;  %641 = vmatpush.msra.mxu0 %v2960_v2  ;;  %v578_v63 = vand.u32 4294901760, %v3036_v50  ;;  %v567_v3 = vsub.f32 %v3030_v43, %v566_v61 }
  0x56   :  { %488 = vmatpush.msrb.mxu2 %v3025_v31  ;;  %v574_v28 = vand.u32 4294901760, %v573_v15  ;;  %v609_v15 = vsub.f32 %v607_v54, %v608_v18 }
  0x57   :  { %687 = vmatpush.msra.mxu1 %v2902_v9  ;;  %644 = vmatpush.msra.mxu0 %v2971_v27  ;;  %v579_v17 = vsub.f32 %v3036_v50, %v578_v63  ;;  %v568_v22 = vand.u32 4294901760, %v567_v3  ;;  %v603_v3 = vsub.f32 %v601_v48, %v602_v6 }
  0x58   :  { %426 = vmatmul.f32.gmra.mxu1 %v2827_v49  ;;  %v437_v49 = vld [vmem:[#allocation3 + $0xa0] sm:$0xff] }
  0x59   :  { %689 = vmatpush.msra.mxu1 %v2904_v23  ;;  %v3027_v33 = vand.u32 4294901760, %v437_v49  ;;  %647 = vmatpush.msra.mxu0 %v3030_v43  ;;  %v580_v59 = vand.u32 4294901760, %v579_v17  ;;  %v604_v17 = vand.u32 4294901760, %v603_v3 }
  0x5a   :  { %569 = vmatpush.msrb.mxu3 %v568_v22  ;;  %v465_v22 = vld [vmem:[#allocation3 + $0x178] sm:$0xff] }
  0x5b   :  { %691 = vmatpush.msra.mxu1 %v2906_v26  ;;  %v3041_v52 = vsub.f32 %v437_v49, %v3027_v33  ;;  %650 = vmatpush.msra.mxu0 %v3033_v44  ;;  %v598_v49 = vand.u32 4294901760, %v597_v60  ;;  %v3176_v60 = vand.u32 4294901760, %v461_v58 }
  0x5c   :  { %490 = vmatpush.msrb.mxu2 %v3027_v33  ;;  %575 = vmatpush.msrb.mxu3 %v574_v28  ;;  %v3137_v28 = vand.u32 4294901760, %v465_v22 }
  0x5d   :  { %693 = vmatpush.msra.mxu1 %v2933_v53  ;;  %v584_v14 = vand.u32 4294901760, %v3041_v52  ;;  %653 = vmatpush.msra.mxu0 %v3036_v50 }
  0x5e   :  { %492 = vmatpush.msrb.mxu2 %v3065_v46  ;;  %581 = vmatpush.msrb.mxu3 %v580_v59  ;;  %v3140_v16 = vsub.f32 %v465_v22, %v3137_v28 }
  0x5f   :  { %695 = vmatpush.msra.mxu1 %v2949_v13  ;;  %v585_v5 = vsub.f32 %v3041_v52, %v584_v14  ;;  %656 = vmatpush.msra.mxu0 %v3041_v52 }
  0x60   :  { %494 = vmatpush.msrb.mxu2 %v3073_v24 }
  0x61   :  { %697 = vmatpush.msra.mxu1 %v3021_v25  ;;  %v586_v36 = vand.u32 4294901760, %v585_v5  ;;  %659 = vmatpush.msra.mxu0 %v3071_v37  ;;  %v610_v5 = vand.u32 4294901760, %v609_v15  ;;  %v463_v37 = vld [vmem:[#allocation3 + $0x168] sm:$0xff] }
  0x62   :  { %496 = vmatpush.msrb.mxu2 %v3080_v55  ;;  %v3150_v8 = vand.u32 4294901760, %v463_v37 }
  0x63   :  { %699 = vmatpush.msra.mxu1 %v3023_v32  ;;  %662 = vmatpush.msra.mxu0 %v595_v35 }
  0x64   :  { %587 = vmatpush.msrb.mxu3 %v586_v36  ;;  %498 = vmatpush.msrb.mxu2 %v3082_v41 }
  0x65   :  { %701 = vmatpush.msra.mxu1 %v3025_v31  ;;  %665 = vmatpush.msra.mxu0 %v601_v48 }
  0x66   :  { %728 = vmatpush.msra.mxu2 %v518_v11  ;;  %593 = vmatpush.msrb.mxu3 %v592_v56 }
  0x67   :  { %703 = vmatpush.msra.mxu1 %v3027_v33  ;;  %668 = vmatpush.msra.mxu0 %v607_v54 }
  0x68   :  { %732 = vmatpush.msra.mxu2 %v524_v47  ;;  %599 = vmatpush.msrb.mxu3 %v598_v49 }
  0x69   :  { %705 = vmatpush.msra.mxu1 %v3065_v46  ;;  %883 = vmatpush.msrb.mxu0 %v3137_v28 }
  0x6a   :  { %736 = vmatpush.msra.mxu2 %v530_v51  ;;  %605 = vmatpush.msrb.mxu3 %v604_v17  ;;  %v3187_v17 = vsub.f32 %v461_v58, %v3176_v60 }
  0x6b   :  { %707 = vmatpush.msra.mxu1 %v3073_v24 }
  0x6c   :  { %740 = vmatpush.msra.mxu2 %v536_v57  ;;  %611 = vmatpush.msrb.mxu3 %v610_v5  ;;  %v459_v5 = vld [vmem:[#allocation3 + $0x148] sm:$0xff] }
  0x6d   :  { %709 = vmatpush.msra.mxu1 %v3080_v55 }
  0x6e   :  { %799 = vmatpush.msra.mxu3 %v2895_v4  ;;  %744 = vmatpush.msra.mxu2 %v542_v45 }
  0x6f   :  { %711 = vmatpush.msra.mxu1 %v3082_v41 }
  0x70   :  { %801 = vmatpush.msra.mxu3 %v2897_v19  ;;  %748 = vmatpush.msra.mxu2 %v548_v1 }
  0x72   :  { %803 = vmatpush.msra.mxu3 %v2899_v20  ;;  %752 = vmatpush.msra.mxu2 %v554_v30  ;;  %v2552_v20 = vld [vmem:[%s4047_s2] ss:$0 sm:$0xff] }
  0x74   :  { %805 = vmatpush.msra.mxu3 %v2902_v9  ;;  %756 = vmatpush.msra.mxu2 %v560_v40 }
  0x76   :  { %807 = vmatpush.msra.mxu3 %v2904_v23  ;;  %760 = vmatpush.msra.mxu2 %v566_v61 }
  0x78   :  { %809 = vmatpush.msra.mxu3 %v2906_v26  ;;  %764 = vmatpush.msra.mxu2 %v572_v62 }
  0x7a   :  { %811 = vmatpush.msra.mxu3 %v2933_v53  ;;  %768 = vmatpush.msra.mxu2 %v578_v63 }
  0x7c   :  { %813 = vmatpush.msra.mxu3 %v2949_v13  ;;  %772 = vmatpush.msra.mxu2 %v584_v14 }
  0x7e   :  { %815 = vmatpush.msra.mxu3 %v3021_v25  ;;  %776 = vmatpush.msra.mxu2 %v590_v38 }
  0x80   :  { %817 = vmatpush.msra.mxu3 %v3023_v32  ;;  %780 = vmatpush.msra.mxu2 %v596_v12 }
  0x82   :  { %819 = vmatpush.msra.mxu3 %v3025_v31  ;;  %784 = vmatpush.msra.mxu2 %v602_v6  ;;  %v460_v6 = vld [vmem:[#allocation3 + $0x150] sm:$0xff] }
  0x83   :  { %v3183_v15 = vand.u32 4294901760, %v460_v6 }
  0x84   :  { %821 = vmatpush.msra.mxu3 %v3027_v33  ;;  %788 = vmatpush.msra.mxu2 %v608_v18 }
  0x86   :  { %823 = vmatpush.msra.mxu3 %v3065_v46  ;;  %v464_v46 = vld [vmem:[#allocation3 + $0x170] sm:$0xff] }
  0x87   :  { %v3142_v59 = vand.u32 4294901760, %v464_v46 }
  0x88   :  { %825 = vmatpush.msra.mxu3 %v3073_v24  ;;  %v933_v24 = vand.u32 4294901760, %v3140_v16 }
  0x89   :  { %v3148_v36 = vsub.f32 %v464_v46, %v3142_v59  ;;  %885 = vmatpush.msrb.mxu0 %v3142_v59 }
  0x8a   :  { %827 = vmatpush.msra.mxu3 %v3080_v55  ;;  %v934_v38 = vsub.f32 %v3140_v16, %v933_v24  ;;  %v3160_v55 = vsub.f32 %v463_v37, %v3150_v8 }
  0x8b   :  { %v939_v35 = vand.u32 4294901760, %v3148_v36  ;;  %887 = vmatpush.msrb.mxu0 %v3150_v8 }
  0x8c   :  { %829 = vmatpush.msra.mxu3 %v3082_v41  ;;  %v3162_v41 = vand.u32 4294901760, %v462_v7  ;;  %v935_v12 = vand.u32 4294901760, %v934_v38  ;;  %v945_v54 = vand.u32 4294901760, %v3160_v55  ;;  %v452_v38 = vld [vmem:[#allocation3 + $0x110] sm:$0xff] }
  0x8d   :  { %v940_v48 = vsub.f32 %v3148_v36, %v939_v35 }
  0x8e   :  { %v3172_v56 = vsub.f32 %v462_v7, %v3162_v41  ;;  %889 = vmatpush.msrb.mxu0 %v3162_v41  ;;  %936 = vmatpush.msrb.mxu1 %v935_v12  ;;  %v946_v49 = vsub.f32 %v3160_v55, %v945_v54 }
  0x8f   :  { %v941_v18 = vand.u32 4294901760, %v940_v48 }
  0x90   :  { %v951_v3 = vand.u32 4294901760, %v3172_v56  ;;  %891 = vmatpush.msrb.mxu0 %v3176_v60 }
  0x91   :  { %942 = vmatpush.msrb.mxu1 %v941_v18  ;;  %v2629_v18 = vmov 0.0  }
  0x92   :  { %893 = vmatpush.msrb.mxu0 %v3183_v15  ;;  %34 = vst [vmem:[#allocation2] sm:$0xff] %v2629_v18 }
  0x93   :  { %35 = vst [vmem:[#allocation2 + $0x8] sm:$0xf] %v2629_v18 }
  0x94   :  { %36 = vst [vmem:[#allocation2 + $0x10] sm:$0xff] %v2629_v18 }
  0x95   :  { %37 = vst [vmem:[#allocation2 + $0x18] sm:$0xf] %v2629_v18 }
  0xa5   :  { %v96_v4 = vpop.f32.mrf.mxu0 }
  0xa6   :  { %v97_v23 = vadd.f32 %v2552_v20, %v96_v4  ;;  %v947_v4 = vand.u32 4294901760, %v946_v49  ;;  %v3282_v49 = vand.u32 4294901760, %v452_v38 }
  0xa8   :  { %948 = vmatpush.msrb.mxu1 %v947_v4 }
  0xad   :  { %v205_v19 = vpop.f32.mrf.mxu1  ;;  %v104_v9 = vpop.f32.mrf.mxu0 }
  0xae   :  { %v206_v10 = vadd.f32 %v205_v19, %v97_v23  ;;  %v105_v39 = vadd.f32 %v2552_v20, %v104_v9  ;;  %v952_v19 = vsub.f32 %v3172_v56, %v951_v3  ;;  %v3195_v20 = vsub.f32 %v460_v6, %v3183_v15 }
  0xaf   :  { %v263_v26 = vpop.f32.mrf.mxu2  ;;  %v307_v34 = vpop.f32.mrf.mxu3  ;;  %v3197_v9 = vand.u32 4294901760, %v459_v5  ;;  %v957_v23 = vand.u32 4294901760, %v3187_v17 }
  0xb0   :  { %v264_v42 = vadd.f32 %v263_v26, %v206_v10  ;;  %v458_v26 = vld [vmem:[#allocation3 + $0x140] sm:$0xff]  ;;  %v953_v10 = vand.u32 4294901760, %v952_v19 }
  0xb1   :  { %895 = vmatpush.msrb.mxu0 %v3197_v9 }
  0xb2   :  { %v308_v47 = vadd.f32 %v307_v34, %v264_v42  ;;  %v3204_v34 = vsub.f32 %v459_v5, %v3197_v9  ;;  %v958_v42 = vsub.f32 %v3187_v17, %v957_v23  ;;  %954 = vmatpush.msrb.mxu1 %v953_v10  ;;  %v451_v5 = vld [vmem:[#allocation3 + $0x108] sm:$0xff] }
  0xb3   :  { %v3289_v10 = vand.u32 4294901760, %v451_v5 }
  0xb5   :  { %v209_v29 = vpop.f32.mrf.mxu1 }
  0xb6   :  { %v210_v51 = vadd.f32 %v209_v29, %v105_v39  ;;  %v963_v29 = vand.u32 4294901760, %v3195_v20  ;;  %v3206_v39 = vand.u32 4294901760, %v458_v26 }
  0xb7   :  { %v268_v53 = vpop.f32.mrf.mxu2  ;;  %v313_v2 = vpop.f32.mrf.mxu3 }
  0xb8   :  { %v269_v13 = vadd.f32 %v268_v53, %v210_v51  ;;  %v969_v51 = vand.u32 4294901760, %v3204_v34  ;;  %v3219_v53 = vsub.f32 %v458_v26, %v3206_v39  ;;  %897 = vmatpush.msrb.mxu0 %v3206_v39 }
  0xba   :  { %v314_v30 = vadd.f32 %v313_v2, %v269_v13  ;;  %v456_v13 = vld [vmem:[#allocation3 + $0x130] sm:$0xff]  ;;  %v970_v2 = vsub.f32 %v3204_v34, %v969_v51 }
  0xc5   :  { %v382_v11 = vpop.f32.mrf.mxu0 }
  0xc6   :  { %v383_v57 = vadd.f32 %v382_v11, %v308_v47  ;;  %v457_v11 = vld [vmem:[#allocation3 + $0x138] sm:$0xff]  ;;  %v964_v47 = vsub.f32 %v3195_v20, %v963_v29 }
  0xcd   :  { %v423_v0 = vpop.f32.mrf.mxu1  ;;  %v386_v27 = vpop.f32.mrf.mxu0 }
  0xce   :  { %v424_v45 = vadd.f32 %v423_v0, %v383_v57  ;;  %v387_v25 = vadd.f32 %v386_v27, %v314_v30  ;;  %v3221_v57 = vand.u32 4294901760, %v457_v11  ;;  %v959_v0 = vand.u32 4294901760, %v958_v42 }
  0xcf   :  { %v3234_v30 = vand.u32 4294901760, %v456_v13  ;;  %v3294_v42 = vsub.f32 %v452_v38, %v3282_v49 }
  0xd0   :  { %v430_v1 = vmax.f32 %v424_v45, 0.0  ;;  %v965_v45 = vand.u32 4294901760, %v964_v47  ;;  %v3231_v27 = vsub.f32 %v457_v11, %v3221_v57  ;;  %960 = vmatpush.msrb.mxu1 %v959_v0  ;;  %899 = vmatpush.msrb.mxu0 %v3221_v57  ;;  %v450_v11 = vld [vmem:[#allocation3 + $0x100] sm:$0xff] }
  0xd2   :  { %v499_v40 = vand.u32 4294901760, %v430_v1  ;;  %966 = vmatpush.msrb.mxu1 %v965_v45  ;;  %901 = vmatpush.msrb.mxu0 %v3234_v30  ;;  %v3303_v45 = vand.u32 4294901760, %v450_v11 }
  0xd4   :  { %v500_v32 = vsub.f32 %v430_v1, %v499_v40  ;;  %613 = vmatmul.f32.vlgmr.msrb.gmra.mxu3 %v499_v40  ;;  %v975_v1 = vand.u32 4294901760, %v3219_v53 }
  0xd5   :  { %v427_v31 = vpop.f32.mrf.mxu1  ;;  %1096 = vmatpush.msrb.mxu3 %v3137_v28 }
  0xd6   :  { %v428_v33 = vadd.f32 %v427_v31, %v387_v25  ;;  %671 = vmatmul.f32.vlgmr.msra.gmra.mxu0 %v500_v32  ;;  %v501_v43 = vand.u32 4294901760, %v500_v32  ;;  %v971_v25 = vand.u32 4294901760, %v970_v2  ;;  %v981_v31 = vand.u32 4294901760, %v3231_v27 }
  0xd7   :  { %1098 = vmatpush.msrb.mxu3 %v3142_v59  ;;  %v1011_v2 = vand.u32 4294901760, %v3294_v42 }
  0xd8   :  { %v431_v44 = vmax.f32 %v428_v33, 0.0  ;;  %715 = vmatmul.f32.vlgmr.msra.gmra.mxu1 %v501_v43  ;;  %v502_v50 = vsub.f32 %v500_v32, %v501_v43  ;;  %v976_v32 = vsub.f32 %v3219_v53, %v975_v1  ;;  %v3246_v43 = vsub.f32 %v456_v13, %v3234_v30 }
  0xd9   :  { %1100 = vmatpush.msrb.mxu3 %v3150_v8  ;;  %972 = vmatpush.msrb.mxu1 %v971_v25  ;;  %v3301_v13 = vsub.f32 %v451_v5, %v3289_v10 }
  0xda   :  { %v507_v52 = vand.u32 4294901760, %v431_v44  ;;  %v503_v61 = vand.u32 4294901760, %v502_v50  ;;  %v977_v50 = vand.u32 4294901760, %v976_v32  ;;  %v1022_v32 = vsub.f32 %v450_v11, %v3303_v45 }
  0xdb   :  { %1102 = vmatpush.msrb.mxu3 %v3162_v41  ;;  %v1017_v25 = vand.u32 4294901760, %v3301_v13 }
  0xdc   :  { %v508_v62 = vsub.f32 %v431_v44, %v507_v52  ;;  %504 = vmatmul.f32.vlgmr.msrb.gmra.mxu2 %v503_v61  ;;  %617 = vmatmul.f32.gmra.mxu3 %v507_v52  ;;  %v454_v44 = vld [vmem:[#allocation3 + $0x120] sm:$0xff] }
  0xdd   :  { %1038 = vmatpush.msrb.mxu2 %v3140_v16  ;;  %1104 = vmatpush.msrb.mxu3 %v3176_v60 }
  0xde   :  { %676 = vmatmul.f32.gmra.mxu0 %v508_v62  ;;  %v509_v63 = vand.u32 4294901760, %v508_v62  ;;  %978 = vmatpush.msrb.mxu1 %v977_v50  ;;  %v1018_v50 = vsub.f32 %v3301_v13, %v1017_v25 }
  0xdf   :  { %1041 = vmatpush.msrb.mxu2 %v3148_v36  ;;  %1106 = vmatpush.msrb.mxu3 %v3183_v15 }
  0xe0   :  { %721 = vmatmul.f32.gmra.mxu1 %v509_v63  ;;  %v510_v14 = vsub.f32 %v508_v62, %v509_v63  ;;  %v3255_v62 = vand.u32 4294901760, %v454_v44  ;;  %v987_v63 = vand.u32 4294901760, %v3246_v43 }
  0xe1   :  { %1044 = vmatpush.msrb.mxu2 %v3160_v55  ;;  %1108 = vmatpush.msrb.mxu3 %v3197_v9 }
  0xe2   :  { %v511_v21 = vand.u32 4294901760, %v510_v14  ;;  %v453_v14 = vld [vmem:[#allocation3 + $0x118] sm:$0xff]  ;;  %v3263_v46 = vsub.f32 %v454_v44, %v3255_v62  ;;  %v988_v7 = vsub.f32 %v3246_v43, %v987_v63  ;;  %v1012_v44 = vsub.f32 %v3294_v42, %v1011_v2 }
  0xe3   :  { %1047 = vmatpush.msrb.mxu2 %v3172_v56  ;;  %1110 = vmatpush.msrb.mxu3 %v3206_v39  ;;  %v3265_v37 = vand.u32 4294901760, %v453_v14 }
  0xe4   :  { %512 = vmatmul.f32.gmra.mxu2 %v511_v21  ;;  %831 = vmatmul.f32.vlgmr.msra.gmra.mxu3 %v499_v40  ;;  %v999_v12 = vand.u32 4294901760, %v3263_v46  ;;  %v989_v6 = vand.u32 4294901760, %v988_v7 }
  0xe5   :  { %1050 = vmatpush.msrb.mxu2 %v3187_v17  ;;  %1112 = vmatpush.msrb.mxu3 %v3221_v57  ;;  %v3278_v48 = vsub.f32 %v453_v14, %v3265_v37  ;;  %v1013_v14 = vand.u32 4294901760, %v1012_v44 }
  0xe6   :  { %v1000_v19 = vsub.f32 %v3263_v46, %v999_v12 }
  0xe7   :  { %1053 = vmatpush.msrb.mxu2 %v3195_v20  ;;  %1114 = vmatpush.msrb.mxu3 %v3234_v30  ;;  %v1005_v26 = vand.u32 4294901760, %v3278_v48 }
  0xe8   :  { %v1001_v47 = vand.u32 4294901760, %v1000_v19 }
  0xe9   :  { %1056 = vmatpush.msrb.mxu2 %v3204_v34  ;;  %v1006_v0 = vsub.f32 %v3278_v48, %v1005_v26 }
  0xeb   :  { %1059 = vmatpush.msrb.mxu2 %v3219_v53 }
  0xec   :  { %790 = vmatmul.f32.vlgmr.msra.gmra.mxu2 %v499_v40  ;;  %835 = vmatmul.f32.gmra.mxu3 %v507_v52  ;;  %v455_v40 = vld [vmem:[#allocation3 + $0x128] sm:$0xff] }
  0xed   :  { %v3241_v33 = vand.u32 4294901760, %v455_v40  ;;  %1062 = vmatpush.msrb.mxu2 %v3231_v27 }
  0xef   :  { %v3253_v61 = vsub.f32 %v455_v40, %v3241_v33  ;;  %903 = vmatpush.msrb.mxu0 %v3241_v33  ;;  %1065 = vmatpush.msrb.mxu2 %v3246_v43  ;;  %v1007_v40 = vand.u32 4294901760, %v1006_v0  ;;  %v2556_v43 = vld [vmem:[%s4048_s3 + $0x3] ss:$0 sm:$0xff] }
  0xf0   :  { %1116 = vmatpush.msrb.mxu3 %v3241_v33 }
  0xf1   :  { %v993_v22 = vand.u32 4294901760, %v3253_v61  ;;  %905 = vmatpush.msrb.mxu0 %v3255_v62  ;;  %1068 = vmatpush.msrb.mxu2 %v3253_v61 }
  0xf2   :  { %1118 = vmatpush.msrb.mxu3 %v3255_v62 }
  0xf3   :  { %v994_v58 = vsub.f32 %v3253_v61, %v993_v22  ;;  %907 = vmatpush.msrb.mxu0 %v3265_v37  ;;  %1071 = vmatpush.msrb.mxu2 %v3263_v46 }
  0xf4   :  { %794 = vmatmul.f32.gmra.mxu2 %v507_v52  ;;  %v982_v52 = vsub.f32 %v3231_v27, %v981_v31  ;;  %1120 = vmatpush.msrb.mxu3 %v3265_v37 }
  0xf5   :  { %v995_v4 = vand.u32 4294901760, %v994_v58  ;;  %909 = vmatpush.msrb.mxu0 %v3282_v49  ;;  %1074 = vmatpush.msrb.mxu2 %v3278_v48 }
  0xf6   :  { %v983_v21 = vand.u32 4294901760, %v982_v52  ;;  %1122 = vmatpush.msrb.mxu3 %v3282_v49  ;;  %v1023_v52 = vand.u32 4294901760, %v1022_v32 }
  0xf7   :  { %911 = vmatpush.msrb.mxu0 %v3289_v10  ;;  %1077 = vmatpush.msrb.mxu2 %v3294_v42 }
  0xf8   :  { %984 = vmatpush.msrb.mxu1 %v983_v21  ;;  %1124 = vmatpush.msrb.mxu3 %v3289_v10  ;;  %v1019_v21 = vand.u32 4294901760, %v1018_v50  ;;  %v1024_v7 = vsub.f32 %v1022_v32, %v1023_v52 }
  0xf9   :  { %913 = vmatpush.msrb.mxu0 %v3303_v45  ;;  %1080 = vmatpush.msrb.mxu2 %v3301_v13 }
  0xfa   :  { %990 = vmatpush.msrb.mxu1 %v989_v6  ;;  %1126 = vmatpush.msrb.mxu3 %v3303_v45  ;;  %v1025_v38 = vand.u32 4294901760, %v1024_v7 }
  0xfb   :  { %1143 = vmatpush.msra.mxu0 %v933_v24  ;;  %1083 = vmatpush.msrb.mxu2 %v1022_v32 }
  0xfc   :  { %996 = vmatpush.msrb.mxu1 %v995_v4 }
  0xfd   :  { %1147 = vmatpush.msra.mxu0 %v939_v35 }
  0xfe   :  { %1002 = vmatpush.msrb.mxu1 %v1001_v47 }
  0xff   :  { %1151 = vmatpush.msra.mxu0 %v945_v54 }
 0x100   :  { %1008 = vmatpush.msrb.mxu1 %v1007_v40  ;;  %v1270_v40 = vld [vmem:[#allocation3 + $0x1e8] sm:$0xff] }
 0x101   :  { %1155 = vmatpush.msra.mxu0 %v951_v3  ;;  %v3383_v50 = vand.u32 4294901760, %v1270_v40 }
 0x102   :  { %1014 = vmatpush.msrb.mxu1 %v1013_v14  ;;  %v1268_v14 = vld [vmem:[#allocation3 + $0x1d8] sm:$0xff] }
 0x103   :  { %1159 = vmatpush.msra.mxu0 %v957_v23 }
 0x104   :  { %1020 = vmatpush.msrb.mxu1 %v1019_v21  ;;  %v1267_v21 = vld [vmem:[#allocation3 + $0x1d0] sm:$0xff] }
 0x105   :  { %1163 = vmatpush.msra.mxu0 %v963_v29 }
 0x106   :  { %1026 = vmatpush.msrb.mxu1 %v1025_v38 }
 0x107   :  { %1167 = vmatpush.msra.mxu0 %v969_v51  ;;  %v2554_v51 = vld [vmem:[%s4048_s3 + $0x1] ss:$0 sm:$0xff] }
 0x108   :  { %1214 = vmatpush.msra.mxu1 %v3137_v28 }
 0x109   :  { %1171 = vmatpush.msra.mxu0 %v975_v1  ;;  %v2555_v1 = vld [vmem:[%s4048_s3 + $0x2] ss:$0 sm:$0xff] }
 0x10a   :  { %1216 = vmatpush.msra.mxu1 %v3142_v59 }
 0x10b   :  { %1175 = vmatpush.msra.mxu0 %v981_v31 }
 0x10c   :  { %1218 = vmatpush.msra.mxu1 %v3150_v8 }
 0x10d   :  { %1179 = vmatpush.msra.mxu0 %v987_v63 }
 0x10e   :  { %1220 = vmatpush.msra.mxu1 %v3162_v41 }
 0x10f   :  { %1183 = vmatpush.msra.mxu0 %v993_v22  ;;  %v2557_v22 = vld [vmem:[%s4048_s3 + $0x4] ss:$0 sm:$0xff] }
 0x110   :  { %1222 = vmatpush.msra.mxu1 %v3176_v60 }
 0x111   :  { %1187 = vmatpush.msra.mxu0 %v999_v12 }
 0x112   :  { %1224 = vmatpush.msra.mxu1 %v3183_v15 }
 0x113   :  { %1191 = vmatpush.msra.mxu0 %v1005_v26 }
 0x114   :  { %1226 = vmatpush.msra.mxu1 %v3197_v9 }
 0x115   :  { %1195 = vmatpush.msra.mxu0 %v1011_v2  ;;  %v1271_v2 = vld [vmem:[#allocation3 + $0x1f0] sm:$0xff] }
 0x116   :  { %1228 = vmatpush.msra.mxu1 %v3206_v39  ;;  %v2553_v39 = vld [vmem:[%s4048_s3] ss:$0 sm:$0xff]  ;;  %v3381_v44 = vand.u32 4294901760, %v1271_v2 }
 0x117   :  { %1199 = vmatpush.msra.mxu0 %v1017_v25 }
 0x118   :  { %1230 = vmatpush.msra.mxu1 %v3221_v57 }
 0x119   :  { %1203 = vmatpush.msra.mxu0 %v1023_v52  ;;  %v1269_v52 = vld [vmem:[#allocation3 + $0x1e0] sm:$0xff] }
 0x11a   :  { %1232 = vmatpush.msra.mxu1 %v3234_v30 }
 0x11c   :  { %1234 = vmatpush.msra.mxu1 %v3241_v33 }
 0x11e   :  { %1236 = vmatpush.msra.mxu1 %v3255_v62 }
 0x120   :  { %1238 = vmatpush.msra.mxu1 %v3265_v37 }
 0x122   :  { %1240 = vmatpush.msra.mxu1 %v3282_v49 }
 0x124   :  { %1242 = vmatpush.msra.mxu1 %v3289_v10 }
 0x126   :  { %1244 = vmatpush.msra.mxu1 %v3303_v45  ;;  %v1272_v45 = vld [vmem:[#allocation3 + $0x1f8] sm:$0xff] }
 0x127   :  { %v3379_v32 = vand.u32 4294901760, %v1272_v45 }
 0x129   :  { %1292 = vmatpush.msra.mxu2 %v3379_v32 }
 0x12b   :  { %1294 = vmatpush.msra.mxu2 %v3381_v44 }
 0x12d   :  { %1296 = vmatpush.msra.mxu2 %v3383_v50 }
 0x153   :  { %v672_v36 = vpop.f32.mrf.mxu0 }
 0x155   :  { %v716_v55 = vpop.f32.mrf.mxu1 }
 0x157   :  { %v614_v16 = vpop.f32.mrf.mxu3 }
 0x15b   :  { %v677_v15 = vpop.f32.mrf.mxu0 }
 0x15d   :  { %v722_v9 = vpop.f32.mrf.mxu1 }
 0x15f   :  { %v505_v24 = vpop.f32.mrf.mxu2  ;;  %v618_v28 = vpop.f32.mrf.mxu3 }
 0x160   :  { %v615_v59 = vadd.f32 %v614_v16, %v505_v24  ;;  %v3385_v16 = vand.u32 4294901760, %v1269_v52  ;;  %v3387_v24 = vand.u32 4294901760, %v1268_v14 }
 0x162   :  { %v673_v35 = vadd.f32 %v672_v36, %v615_v59  ;;  %v3393_v59 = vsub.f32 %v1271_v2, %v3381_v44  ;;  %v3396_v36 = vsub.f32 %v1270_v40, %v3383_v50  ;;  %1298 = vmatpush.msra.mxu2 %v3385_v16 }
 0x164   :  { %v717_v54 = vadd.f32 %v716_v55, %v673_v35  ;;  %1300 = vmatpush.msra.mxu2 %v3387_v24 }
 0x167   :  { %v513_v8 = vpop.f32.mrf.mxu2  ;;  %v832_v56 = vpop.f32.mrf.mxu3 }
 0x168   :  { %v619_v41 = vadd.f32 %v618_v28, %v513_v8  ;;  %v3390_v28 = vsub.f32 %v1272_v45, %v3379_v32  ;;  %v3399_v8 = vand.u32 4294901760, %v1267_v21 }
 0x16a   :  { %v678_v17 = vadd.f32 %v677_v15, %v619_v41  ;;  %v3403_v41 = vsub.f32 %v1269_v52, %v3385_v16  ;;  %v3413_v15 = vsub.f32 %v1267_v21, %v3399_v8  ;;  %1302 = vmatpush.msra.mxu2 %v3399_v8 }
 0x16c   :  { %v723_v23 = vadd.f32 %v722_v9, %v678_v17  ;;  %v1266_v17 = vld [vmem:[#allocation3 + $0x1c8] sm:$0xff] }
 0x16f   :  { %v791_v60 = vpop.f32.mrf.mxu2  ;;  %v836_v53 = vpop.f32.mrf.mxu3 }
 0x170   :  { %v792_v3 = vadd.f32 %v791_v60, %v717_v54  ;;  %v3406_v54 = vsub.f32 %v1268_v14, %v3387_v24  ;;  %v1348_v60 = vand.u32 4294901760, %v3393_v59 }
 0x172   :  { %v833_v20 = vadd.f32 %v832_v56, %v792_v3  ;;  %v1342_v56 = vand.u32 4294901760, %v3390_v28  ;;  %v1354_v3 = vand.u32 4294901760, %v3396_v36 }
 0x174   :  { %839 = vst [vmem:[#allocation2 + $0x2] sm:$0xff] %v833_v20  ;;  %v861_v63 = vmul.f32 %v2555_v1, %v833_v20 }
 0x177   :  { %v795_v29 = vpop.f32.mrf.mxu2 }
 0x178   :  { %v796_v34 = vadd.f32 %v795_v29, %v723_v23  ;;  %v1360_v23 = vand.u32 4294901760, %v3403_v41  ;;  %v1343_v29 = vsub.f32 %v3390_v28, %v1342_v56 }
 0x17a   :  { %v837_v57 = vadd.f32 %v836_v53, %v796_v34  ;;  %v1349_v34 = vsub.f32 %v3393_v59, %v1348_v60 }
 0x17b   :  { %v842_v27 = vld [vmem:[#allocation2] sm:$0xff] }
 0x17c   :  { %v850_v30 = vld [vmem:[#allocation2 + $0x1] sm:$0xff]  ;;  %840 = vst [vmem:[#allocation2 + $0x12] sm:$0xff] %v837_v57  ;;  %v845_v31 = vmul.f32 %v2553_v39, %v842_v27  ;;  %v862_v42 = vmul.f32 %v2555_v1, %v837_v57  ;;  %v3429_v57 = vand.u32 4294901760, %v1266_v17  ;;  %v1344_v1 = vand.u32 4294901760, %v1343_v29 }
 0x17d   :  { %v853_v33 = vmul.f32 %v2554_v51, %v850_v30  ;;  %v866_v61 = vld [vmem:[#allocation2 + $0x3] sm:$0xff]  ;;  %v1350_v27 = vand.u32 4294901760, %v1349_v34  ;;  %v1361_v30 = vsub.f32 %v3403_v41, %v1360_v23  ;;  %v1259_v34 = vld [vmem:[#allocation3 + $0x190] sm:$0xff] }
 0x17e   :  { %v874_v46 = vld [vmem:[#allocation2 + $0x4] sm:$0xff]  ;;  %v869_v58 = vmul.f32 %v2556_v43, %v866_v61  ;;  %1345 = vmatpush.msra.mxu3 %v1344_v1  ;;  %1304 = vmatpush.msra.mxu2 %v3429_v57 }
 0x17f   :  { %v855_v62 = vadd.f32 %v853_v33, %v845_v31  ;;  %v877_v48 = vmul.f32 %v2557_v22, %v874_v46  ;;  %v1372_v31 = vand.u32 4294901760, %v3413_v15  ;;  %v1362_v46 = vand.u32 4294901760, %v1361_v30 }
 0x180   :  { %1351 = vmatpush.msra.mxu3 %v1350_v27  ;;  %v3525_v27 = vand.u32 4294901760, %v1259_v34 }
 0x181   :  { %v863_v37 = vadd.f32 %v861_v63, %v855_v62 }
 0x183   :  { %v871_v12 = vadd.f32 %v869_v58, %v863_v37  ;;  %v843_v6 = vld [vmem:[#allocation2 + $0x10] sm:$0xff]  ;;  %v1373_v37 = vsub.f32 %v3413_v15, %v1372_v31 }
 0x184   :  { %v851_v18 = vld [vmem:[#allocation2 + $0x11] sm:$0xff]  ;;  %v846_v5 = vmul.f32 %v2553_v39, %v843_v6  ;;  %v1355_v39 = vsub.f32 %v3396_v36, %v1354_v3 }
 0x185   :  { %v879_v49 = vadd.f32 %v877_v48, %v871_v12  ;;  %v854_v4 = vmul.f32 %v2554_v51, %v851_v18  ;;  %v867_v19 = vld [vmem:[#allocation2 + $0x13] sm:$0xff]  ;;  %v1366_v51 = vand.u32 4294901760, %v3406_v54  ;;  %v1374_v6 = vand.u32 4294901760, %v1373_v37 }
 0x186   :  { %v875_v11 = vld [vmem:[#allocation2 + $0x14] sm:$0xff]  ;;  %v870_v13 = vmul.f32 %v2556_v43, %v867_v19  ;;  %v3438_v43 = vsub.f32 %v1266_v17, %v3429_v57  ;;  %v1356_v61 = vand.u32 4294901760, %v1355_v39 }
 0x187   :  { %v3375_v26 = vand.u32 4294901760, %v879_v49  ;;  %v856_v10 = vadd.f32 %v854_v4, %v846_v5  ;;  %v878_v25 = vmul.f32 %v2557_v22, %v875_v11  ;;  %v1367_v62 = vsub.f32 %v3406_v54, %v1366_v51  ;;  %v1264_v4 = vld [vmem:[#allocation3 + $0x1b8] sm:$0xff] }
 0x188   :  { %v1378_v22 = vand.u32 4294901760, %v3438_v43  ;;  %1357 = vmatpush.msra.mxu3 %v1356_v61 }
 0x189   :  { %1028 = vmatmul.f32.vlgmr.msrb.gmra.mxu1 %v3375_v26  ;;  %v915_v47 = vsub.f32 %v879_v49, %v3375_v26  ;;  %v864_v0 = vadd.f32 %v862_v42, %v856_v10  ;;  %v1368_v12 = vand.u32 4294901760, %v1367_v62  ;;  %v1265_v49 = vld [vmem:[#allocation3 + $0x1c0] sm:$0xff]  ;;  %v3470_v10 = vand.u32 4294901760, %v1264_v4  ;;  %v1263_v42 = vld [vmem:[#allocation3 + $0x1b0] sm:$0xff] }
 0x18a   :  { %1505 = vmatpush.msrb.mxu1 %v3379_v32  ;;  %v1379_v48 = vsub.f32 %v3438_v43, %v1378_v22  ;;  %1363 = vmatpush.msra.mxu3 %v1362_v46  ;;  %v3465_v5 = vand.u32 4294901760, %v1265_v49 }
 0x18b   :  { %1086 = vmatmul.f32.vlgmr.msrb.gmra.mxu2 %v915_v47  ;;  %v916_v7 = vand.u32 4294901760, %v915_v47  ;;  %v872_v38 = vadd.f32 %v870_v13, %v864_v0  ;;  %v1262_v0 = vld [vmem:[#allocation3 + $0x1a8] sm:$0xff] }
 0x18c   :  { %1507 = vmatpush.msrb.mxu1 %v3381_v44  ;;  %1369 = vmatpush.msra.mxu3 %v1368_v12  ;;  %v1380_v18 = vand.u32 4294901760, %v1379_v48  ;;  %v3468_v19 = vsub.f32 %v1265_v49, %v3465_v5  ;;  %v3490_v40 = vand.u32 4294901760, %v1262_v0 }
 0x18d   :  { %1130 = vmatmul.f32.vlgmr.msrb.gmra.mxu3 %v916_v7  ;;  %v917_v35 = vsub.f32 %v915_v47, %v916_v7  ;;  %v880_v55 = vadd.f32 %v878_v25, %v872_v38  ;;  %1306 = vmatpush.msra.mxu2 %v3465_v5  ;;  %v3478_v47 = vand.u32 4294901760, %v1263_v42  ;;  %v1261_v25 = vld [vmem:[#allocation3 + $0x1a0] sm:$0xff] }
 0x18e   :  { %1509 = vmatpush.msrb.mxu1 %v3383_v50  ;;  %1375 = vmatpush.msra.mxu3 %v1374_v6  ;;  %v1384_v11 = vand.u32 4294901760, %v3468_v19  ;;  %v3500_v7 = vsub.f32 %v1262_v0, %v3490_v40  ;;  %v3504_v38 = vand.u32 4294901760, %v1261_v25 }
 0x18f   :  { %v918_v20 = vand.u32 4294901760, %v917_v35  ;;  %v922_v9 = vand.u32 4294901760, %v880_v55  ;;  %1308 = vmatpush.msra.mxu2 %v3470_v10  ;;  %v3488_v2 = vsub.f32 %v1263_v42, %v3478_v47  ;;  %v1260_v35 = vld [vmem:[#allocation3 + $0x198] sm:$0xff] }
 0x190   :  { %1511 = vmatpush.msrb.mxu1 %v3385_v16  ;;  %1381 = vmatpush.msra.mxu3 %v1380_v18  ;;  %v1385_v13 = vsub.f32 %v3468_v19, %v1384_v11  ;;  %v3515_v29 = vsub.f32 %v1261_v25, %v3504_v38 }
 0x191   :  { %919 = vmatmul.f32.vlgmr.msrb.gmra.mxu0 %v918_v20  ;;  %1032 = vmatmul.f32.gmra.mxu1 %v922_v9  ;;  %v923_v53 = vsub.f32 %v880_v55, %v922_v9  ;;  %v1396_v21 = vand.u32 4294901760, %v3488_v2  ;;  %v1402_v20 = vand.u32 4294901760, %v3500_v7 }
 0x192   :  { %1447 = vmatpush.msrb.mxu0 %v3390_v28  ;;  %1513 = vmatpush.msrb.mxu1 %v3387_v24  ;;  %v1386_v52 = vand.u32 4294901760, %v1385_v13  ;;  %v1408_v30 = vand.u32 4294901760, %v3515_v29 }
 0x193   :  { %1091 = vmatmul.f32.gmra.mxu2 %v923_v53  ;;  %v924_v33 = vand.u32 4294901760, %v923_v53  ;;  %v1397_v17 = vsub.f32 %v3488_v2, %v1396_v21 }
 0x194   :  { %1450 = vmatpush.msrb.mxu0 %v3393_v59  ;;  %1515 = vmatpush.msrb.mxu1 %v3399_v8  ;;  %v1409_v37 = vsub.f32 %v3515_v29, %v1408_v30 }
 0x195   :  { %1136 = vmatmul.f32.gmra.mxu3 %v924_v33  ;;  %v925_v63 = vsub.f32 %v923_v53, %v924_v33  ;;  %1310 = vmatpush.msra.mxu2 %v3478_v47  ;;  %v1398_v39 = vand.u32 4294901760, %v1397_v17  ;;  %v1403_v53 = vsub.f32 %v3500_v7, %v1402_v20  ;;  %v1258_v33 = vld [vmem:[#allocation3 + $0x188] sm:$0xff] }
 0x196   :  { %1453 = vmatpush.msrb.mxu0 %v3396_v36  ;;  %1517 = vmatpush.msrb.mxu1 %v3429_v57  ;;  %v3532_v46 = vand.u32 4294901760, %v1258_v33  ;;  %v1410_v49 = vand.u32 4294901760, %v1409_v37 }
 0x197   :  { %v926_v58 = vand.u32 4294901760, %v925_v63  ;;  %1312 = vmatpush.msra.mxu2 %v3490_v40  ;;  %1387 = vmatpush.msra.mxu3 %v1386_v52  ;;  %v1404_v61 = vand.u32 4294901760, %v1403_v53  ;;  %v1419_v63 = vsub.f32 %v1259_v34, %v3525_v27 }
 0x198   :  { %1456 = vmatpush.msrb.mxu0 %v3403_v41  ;;  %1519 = vmatpush.msrb.mxu1 %v3465_v5  ;;  %v1425_v6 = vsub.f32 %v1258_v33, %v3532_v46  ;;  %v1287_v33 = vld [vmem:[#allocation3 + $0x268] sm:$0xff] }
 0x199   :  { %927 = vmatmul.f32.gmra.mxu0 %v926_v58  ;;  %1246 = vmatmul.f32.vlgmr.msra.gmra.mxu1 %v3375_v26  ;;  %v1257_v58 = vld [vmem:[#allocation3 + $0x180] sm:$0xff]  ;;  %v1420_v48 = vand.u32 4294901760, %v1419_v63 }
 0x19a   :  { %1459 = vmatpush.msrb.mxu0 %v3406_v54  ;;  %1521 = vmatpush.msrb.mxu1 %v3470_v10  ;;  %v3540_v18 = vand.u32 4294901760, %v1257_v58  ;;  %v1426_v0 = vand.u32 4294901760, %v1425_v6 }
 0x19b   :  { %1314 = vmatpush.msra.mxu2 %v3504_v38  ;;  %v1421_v42 = vsub.f32 %v1419_v63, %v1420_v48 }
 0x19c   :  { %1462 = vmatpush.msrb.mxu0 %v3413_v15  ;;  %1523 = vmatpush.msrb.mxu1 %v3478_v47  ;;  %v1431_v13 = vsub.f32 %v1257_v58, %v3540_v18  ;;  %v1427_v52 = vsub.f32 %v1425_v6, %v1426_v0 }
 0x19d   :  { %v1422_v25 = vand.u32 4294901760, %v1421_v42 }
 0x19e   :  { %1465 = vmatpush.msrb.mxu0 %v3438_v43  ;;  %1525 = vmatpush.msrb.mxu1 %v3490_v40 }
 0x1a0   :  { %1468 = vmatpush.msrb.mxu0 %v3468_v19  ;;  %1527 = vmatpush.msrb.mxu1 %v3504_v38 }
 0x1a1   :  { %1205 = vmatmul.f32.vlgmr.msra.gmra.mxu0 %v3375_v26  ;;  %1250 = vmatmul.f32.gmra.mxu1 %v922_v9  ;;  %v3476_v26 = vsub.f32 %v1264_v4, %v3470_v10 }
 0x1a3   :  { %v1390_v45 = vand.u32 4294901760, %v3476_v26  ;;  %1471 = vmatpush.msrb.mxu0 %v3476_v26 }
 0x1a5   :  { %v1391_v14 = vsub.f32 %v3476_v26, %v1390_v45  ;;  %1474 = vmatpush.msrb.mxu0 %v3488_v2 }
 0x1a7   :  { %v1392_v55 = vand.u32 4294901760, %v1391_v14  ;;  %1477 = vmatpush.msrb.mxu0 %v3500_v7  ;;  %v1432_v14 = vand.u32 4294901760, %v1431_v13 }
 0x1a9   :  { %1209 = vmatmul.f32.gmra.mxu0 %v922_v9  ;;  %v3511_v9 = vand.u32 4294901760, %v1260_v35  ;;  %1393 = vmatpush.msra.mxu3 %v1392_v55  ;;  %v1433_v55 = vsub.f32 %v1431_v13, %v1432_v14 }
 0x1aa   :  { %1480 = vmatpush.msrb.mxu0 %v3515_v29 }
 0x1ab   :  { %v3523_v1 = vsub.f32 %v1260_v35, %v3511_v9  ;;  %1316 = vmatpush.msra.mxu2 %v3511_v9  ;;  %1399 = vmatpush.msra.mxu3 %v1398_v39  ;;  %v1428_v35 = vand.u32 4294901760, %v1427_v52  ;;  %v1434_v17 = vand.u32 4294901760, %v1433_v55  ;;  %v1289_v39 = vld [vmem:[#allocation3 + $0x278] sm:$0xff] }
 0x1ac   :  { %1529 = vmatpush.msrb.mxu1 %v3511_v9  ;;  %v3589_v53 = vand.u32 4294901760, %v1289_v39 }
 0x1ad   :  { %v1414_v62 = vand.u32 4294901760, %v3523_v1  ;;  %1318 = vmatpush.msra.mxu2 %v3525_v27  ;;  %1483 = vmatpush.msrb.mxu0 %v3523_v1 }
 0x1ae   :  { %1405 = vmatpush.msra.mxu3 %v1404_v61  ;;  %1531 = vmatpush.msrb.mxu1 %v3525_v27 }
 0x1af   :  { %v1415_v12 = vsub.f32 %v3523_v1, %v1414_v62  ;;  %1320 = vmatpush.msra.mxu2 %v3532_v46  ;;  %1486 = vmatpush.msrb.mxu0 %v1419_v63  ;;  %v1288_v1 = vld [vmem:[#allocation3 + $0x270] sm:$0xff]  ;;  %v3602_v63 = vand.u32 4294901760, %v1287_v33 }
 0x1b0   :  { %1533 = vmatpush.msrb.mxu1 %v3532_v46  ;;  %1411 = vmatpush.msra.mxu3 %v1410_v49 }
 0x1b1   :  { %v1416_v4 = vand.u32 4294901760, %v1415_v12  ;;  %1322 = vmatpush.msra.mxu2 %v3540_v18  ;;  %1489 = vmatpush.msrb.mxu0 %v1425_v6  ;;  %v3612_v12 = vsub.f32 %v1287_v33, %v3602_v63  ;;  %v1285_v6 = vld [vmem:[#allocation3 + $0x258] sm:$0xff] }
 0x1b2   :  { %1535 = vmatpush.msrb.mxu1 %v3540_v18 }
 0x1b3   :  { %1552 = vmatpush.msrb.mxu2 %v1342_v56  ;;  %1417 = vmatpush.msra.mxu3 %v1416_v4  ;;  %v1770_v4 = vand.u32 4294901760, %v3612_v12 }
 0x1b4   :  { %1492 = vmatpush.msrb.mxu0 %v1431_v13  ;;  %v1284_v13 = vld [vmem:[#allocation3 + $0x250] sm:$0xff] }
 0x1b5   :  { %1556 = vmatpush.msrb.mxu2 %v1348_v60  ;;  %1423 = vmatpush.msra.mxu3 %v1422_v25  ;;  %v1771_v52 = vsub.f32 %v3612_v12, %v1770_v4 }
 0x1b6   :  { %1708 = vmatpush.msra.mxu0 %v3589_v53 }
 0x1b7   :  { %1560 = vmatpush.msrb.mxu2 %v1354_v3  ;;  %1429 = vmatpush.msra.mxu3 %v1428_v35  ;;  %v3635_v35 = vand.u32 4294901760, %v1284_v13 }
 0x1b9   :  { %1564 = vmatpush.msrb.mxu2 %v1360_v23  ;;  %1435 = vmatpush.msra.mxu3 %v1434_v17  ;;  %v1283_v17 = vld [vmem:[#allocation3 + $0x248] sm:$0xff] }
 0x1bb   :  { %1623 = vmatpush.msrb.mxu3 %v3379_v32  ;;  %1568 = vmatpush.msrb.mxu2 %v1366_v51 }
 0x1bd   :  { %1625 = vmatpush.msrb.mxu3 %v3381_v44  ;;  %1572 = vmatpush.msrb.mxu2 %v1372_v31  ;;  %v2558_v44 = vld [vmem:[%s4047_s2 + $0x1] ss:$0 sm:$0xff] }
 0x1bf   :  { %1627 = vmatpush.msrb.mxu3 %v3383_v50  ;;  %1576 = vmatpush.msrb.mxu2 %v1378_v22 }
 0x1c1   :  { %1629 = vmatpush.msrb.mxu3 %v3385_v16  ;;  %1580 = vmatpush.msrb.mxu2 %v1384_v11 }
 0x1c3   :  { %1631 = vmatpush.msrb.mxu3 %v3387_v24  ;;  %1584 = vmatpush.msrb.mxu2 %v1390_v45 }
 0x1c5   :  { %1633 = vmatpush.msrb.mxu3 %v3399_v8  ;;  %1588 = vmatpush.msrb.mxu2 %v1396_v21 }
 0x1c7   :  { %1635 = vmatpush.msrb.mxu3 %v3429_v57  ;;  %1592 = vmatpush.msrb.mxu2 %v1402_v20 }
 0x1c9   :  { %1637 = vmatpush.msrb.mxu3 %v3465_v5  ;;  %1596 = vmatpush.msrb.mxu2 %v1408_v30  ;;  %v3594_v30 = vand.u32 4294901760, %v1288_v1 }
 0x1cb   :  { %1639 = vmatpush.msrb.mxu3 %v3470_v10  ;;  %1600 = vmatpush.msrb.mxu2 %v1414_v62  ;;  %v3600_v62 = vsub.f32 %v1288_v1, %v3594_v30 }
 0x1cc   :  { %1710 = vmatpush.msra.mxu0 %v3594_v30 }
 0x1cd   :  { %1641 = vmatpush.msrb.mxu3 %v3478_v47  ;;  %1604 = vmatpush.msrb.mxu2 %v1420_v48  ;;  %v1764_v58 = vand.u32 4294901760, %v3600_v62 }
 0x1ce   :  { %1712 = vmatpush.msra.mxu0 %v3602_v63 }
 0x1cf   :  { %1643 = vmatpush.msrb.mxu3 %v3490_v40  ;;  %1608 = vmatpush.msrb.mxu2 %v1426_v0  ;;  %v1765_v49 = vsub.f32 %v3600_v62, %v1764_v58  ;;  %v3628_v0 = vand.u32 4294901760, %v1285_v6 }
 0x1d1   :  { %1645 = vmatpush.msrb.mxu3 %v3504_v38  ;;  %1612 = vmatpush.msrb.mxu2 %v1432_v14  ;;  %v1766_v25 = vand.u32 4294901760, %v1765_v49  ;;  %v3639_v55 = vsub.f32 %v1285_v6, %v3628_v0 }
 0x1d3   :  { %1647 = vmatpush.msrb.mxu3 %v3511_v9 }
 0x1d5   :  { %1649 = vmatpush.msrb.mxu3 %v3525_v27  ;;  %v3592_v27 = vsub.f32 %v1289_v39, %v3589_v53 }
 0x1d7   :  { %1651 = vmatpush.msrb.mxu3 %v3532_v46  ;;  %v1758_v61 = vand.u32 4294901760, %v3592_v27  ;;  %v1286_v46 = vld [vmem:[#allocation3 + $0x260] sm:$0xff] }
 0x1d8   :  { %v3614_v48 = vand.u32 4294901760, %v1286_v46 }
 0x1d9   :  { %1653 = vmatpush.msrb.mxu3 %v3540_v18  ;;  %v1759_v37 = vsub.f32 %v3592_v27, %v1758_v61 }
 0x1da   :  { %v3624_v42 = vsub.f32 %v1286_v46, %v3614_v48  ;;  %1714 = vmatpush.msra.mxu0 %v3614_v48 }
 0x1db   :  { %v1760_v18 = vand.u32 4294901760, %v1759_v37  ;;  %v1276_v37 = vld [vmem:[#allocation3 + $0x210] sm:$0xff] }
 0x1dc   :  { %v1776_v14 = vand.u32 4294901760, %v3624_v42  ;;  %1716 = vmatpush.msra.mxu0 %v3628_v0 }
 0x1dd   :  { %1761 = vmatpush.msra.mxu1 %v1760_v18 }
 0x1de   :  { %1718 = vmatpush.msra.mxu0 %v3635_v35 }
 0x1df   :  { %1767 = vmatpush.msra.mxu1 %v1766_v25 }
 0x206   :  { %v1029_v32 = vpop.f32.mrf.mxu1 }
 0x20e   :  { %v920_v50 = vpop.f32.mrf.mxu0  ;;  %v1033_v24 = vpop.f32.mrf.mxu1 }
 0x20f   :  { %v921_v16 = vadd.f32 %v2558_v44, %v920_v50  ;;  %v1087_v59 = vpop.f32.mrf.mxu2  ;;  %v3647_v50 = vsub.f32 %v1284_v13, %v3635_v35  ;;  %v3732_v13 = vand.u32 4294901760, %v1276_v37 }
 0x210   :  { %v1131_v54 = vpop.f32.mrf.mxu3 }
 0x211   :  { %v1030_v28 = vadd.f32 %v1029_v32, %v921_v16  ;;  %v1772_v32 = vand.u32 4294901760, %v1771_v52  ;;  %v3649_v16 = vand.u32 4294901760, %v1283_v17  ;;  %v1275_v52 = vld [vmem:[#allocation3 + $0x208] sm:$0xff] }
 0x213   :  { %v1088_v8 = vadd.f32 %v1087_v59, %v1030_v28  ;;  %v1282_v28 = vld [vmem:[#allocation3 + $0x240] sm:$0xff]  ;;  %1773 = vmatpush.msra.mxu1 %v1772_v32  ;;  %1720 = vmatpush.msra.mxu0 %v3649_v16 }
 0x215   :  { %v1132_v56 = vadd.f32 %v1131_v54, %v1088_v8  ;;  %v3656_v8 = vsub.f32 %v1283_v17, %v3649_v16 }
 0x216   :  { %v928_v36 = vpop.f32.mrf.mxu0  ;;  %v1247_v3 = vpop.f32.mrf.mxu1 }
 0x217   :  { %v929_v41 = vadd.f32 %v2558_v44, %v928_v36  ;;  %v1092_v51 = vpop.f32.mrf.mxu2  ;;  %v1777_v44 = vsub.f32 %v3624_v42, %v1776_v14  ;;  %v1788_v36 = vand.u32 4294901760, %v3647_v50 }
 0x218   :  { %v1137_v22 = vpop.f32.mrf.mxu3 }
 0x219   :  { %v1034_v60 = vadd.f32 %v1033_v24, %v929_v41  ;;  %v1782_v24 = vand.u32 4294901760, %v3639_v55  ;;  %v1778_v59 = vand.u32 4294901760, %v1777_v44  ;;  %v3658_v41 = vand.u32 4294901760, %v1282_v28 }
 0x21b   :  { %v1093_v57 = vadd.f32 %v1092_v51, %v1034_v60  ;;  %v1783_v54 = vsub.f32 %v3639_v55, %v1782_v24  ;;  %1779 = vmatpush.msra.mxu1 %v1778_v59  ;;  %v1789_v60 = vsub.f32 %v3647_v50, %v1788_v36  ;;  %1722 = vmatpush.msra.mxu0 %v3658_v41  ;;  %v3746_v59 = vand.u32 4294901760, %v1275_v52 }
 0x21d   :  { %v1138_v5 = vadd.f32 %v1137_v22, %v1093_v57  ;;  %v1784_v51 = vand.u32 4294901760, %v1783_v54  ;;  %v1280_v57 = vld [vmem:[#allocation3 + $0x230] sm:$0xff]  ;;  %v1274_v54 = vld [vmem:[#allocation3 + $0x200] sm:$0xff] }
 0x21e   :  { %v1206_v15 = vpop.f32.mrf.mxu0  ;;  %v1251_v47 = vpop.f32.mrf.mxu1 }
 0x21f   :  { %v1207_v23 = vadd.f32 %v1206_v15, %v1132_v56  ;;  %v1281_v56 = vld [vmem:[#allocation3 + $0x238] sm:$0xff]  ;;  %v3671_v15 = vsub.f32 %v1282_v28, %v3658_v41  ;;  %1785 = vmatpush.msra.mxu1 %v1784_v51  ;;  %v3742_v28 = vsub.f32 %v1276_v37, %v3732_v13 }
 0x221   :  { %v1248_v31 = vadd.f32 %v1247_v3, %v1207_v23  ;;  %v1794_v3 = vand.u32 4294901760, %v3656_v8  ;;  %v3673_v23 = vand.u32 4294901760, %v1281_v56  ;;  %v1800_v22 = vand.u32 4294901760, %v3671_v15 }
 0x222   :  { %v1836_v51 = vand.u32 4294901760, %v3742_v28 }
 0x223   :  { %v1254_v43 = vmax.f32 %v1248_v31, 0.0  ;;  %v1790_v31 = vand.u32 4294901760, %v1789_v60  ;;  %1724 = vmatpush.msra.mxu0 %v3673_v23 }
 0x225   :  { %v1323_v19 = vand.u32 4294901760, %v1254_v43  ;;  %1791 = vmatpush.msra.mxu1 %v1790_v31  ;;  %v1841_v31 = vsub.f32 %v1275_v52, %v3746_v59 }
 0x226   :  { %v1210_v10 = vpop.f32.mrf.mxu0 }
 0x227   :  { %v1324_v11 = vsub.f32 %v1254_v43, %v1323_v19  ;;  %v1211_v26 = vadd.f32 %v1210_v10, %v1138_v5  ;;  %1437 = vmatmul.f32.vlgmr.msra.gmra.mxu3 %v1323_v19  ;;  %v1795_v43 = vsub.f32 %v3656_v8, %v1794_v3  ;;  %v3683_v5 = vsub.f32 %v1281_v56, %v3673_v23  ;;  %v1279_v10 = vld [vmem:[#allocation3 + $0x228] sm:$0xff] }
 0x228   :  { %1921 = vmatpush.msra.mxu3 %v3589_v53 }
 0x229   :  { %v1252_v45 = vadd.f32 %v1251_v47, %v1211_v26  ;;  %1495 = vmatmul.f32.vlgmr.msrb.gmra.mxu0 %v1324_v11  ;;  %v1325_v2 = vand.u32 4294901760, %v1324_v11  ;;  %v1801_v26 = vsub.f32 %v3671_v15, %v1800_v22  ;;  %v1806_v47 = vand.u32 4294901760, %v3683_v5 }
 0x22a   :  { %1923 = vmatpush.msra.mxu3 %v3594_v30 }
 0x22b   :  { %v1255_v40 = vmax.f32 %v1252_v45, 0.0  ;;  %1539 = vmatmul.f32.vlgmr.msrb.gmra.mxu1 %v1325_v2  ;;  %v1326_v21 = vsub.f32 %v1324_v11, %v1325_v2  ;;  %v1796_v11 = vand.u32 4294901760, %v1795_v43  ;;  %v3693_v45 = vand.u32 4294901760, %v1279_v10 }
 0x22c   :  { %1925 = vmatpush.msra.mxu3 %v3602_v63 }
 0x22d   :  { %v1331_v7 = vand.u32 4294901760, %v1255_v40  ;;  %v1327_v38 = vand.u32 4294901760, %v1326_v21  ;;  %v1802_v21 = vand.u32 4294901760, %v1801_v26  ;;  %1797 = vmatpush.msra.mxu1 %v1796_v11  ;;  %v1842_v26 = vand.u32 4294901760, %v1841_v31 }
 0x22e   :  { %1927 = vmatpush.msra.mxu3 %v3614_v48 }
 0x22f   :  { %1328 = vmatmul.f32.vlgmr.msra.gmra.mxu2 %v1327_v38  ;;  %1441 = vmatmul.f32.gmra.mxu3 %v1331_v7  ;;  %v1332_v20 = vsub.f32 %v1255_v40, %v1331_v7  ;;  %v1278_v40 = vld [vmem:[#allocation3 + $0x220] sm:$0xff]  ;;  %v3705_v38 = vsub.f32 %v1279_v10, %v3693_v45  ;;  %v1837_v10 = vsub.f32 %v3742_v28, %v1836_v51 }
 0x230   :  { %1863 = vmatpush.msra.mxu2 %v3592_v27  ;;  %1929 = vmatpush.msra.mxu3 %v3628_v0 }
 0x231   :  { %1500 = vmatmul.f32.gmra.mxu0 %v1332_v20  ;;  %v1333_v9 = vand.u32 4294901760, %v1332_v20  ;;  %v1818_v39 = vand.u32 4294901760, %v3705_v38  ;;  %1803 = vmatpush.msra.mxu1 %v1802_v21 }
 0x232   :  { %1866 = vmatpush.msra.mxu2 %v3600_v62  ;;  %1931 = vmatpush.msra.mxu3 %v3635_v35 }
 0x233   :  { %1545 = vmatmul.f32.gmra.mxu1 %v1333_v9  ;;  %v1334_v29 = vsub.f32 %v1332_v20, %v1333_v9  ;;  %v3707_v20 = vand.u32 4294901760, %v1278_v40  ;;  %v1819_v6 = vsub.f32 %v3705_v38, %v1818_v39 }
 0x234   :  { %1869 = vmatpush.msra.mxu2 %v3612_v12  ;;  %1933 = vmatpush.msra.mxu3 %v3649_v16 }
 0x235   :  { %v1335_v34 = vand.u32 4294901760, %v1334_v29  ;;  %v1277_v29 = vld [vmem:[#allocation3 + $0x218] sm:$0xff]  ;;  %v3715_v1 = vsub.f32 %v1278_v40, %v3707_v20  ;;  %v1820_v17 = vand.u32 4294901760, %v1819_v6  ;;  %v1838_v40 = vand.u32 4294901760, %v1837_v10 }
 0x236   :  { %1872 = vmatpush.msra.mxu2 %v3624_v42  ;;  %1935 = vmatpush.msra.mxu3 %v3658_v41  ;;  %v3717_v33 = vand.u32 4294901760, %v1277_v29 }
 0x237   :  { %1336 = vmatmul.f32.gmra.mxu2 %v1335_v34  ;;  %1655 = vmatmul.f32.vlgmr.msrb.gmra.mxu3 %v1323_v19  ;;  %v1824_v18 = vand.u32 4294901760, %v3715_v1 }
 0x238   :  { %1875 = vmatpush.msra.mxu2 %v3639_v55  ;;  %1937 = vmatpush.msra.mxu3 %v3673_v23  ;;  %v3730_v49 = vsub.f32 %v1277_v29, %v3717_v33 }
 0x239   :  { %v1825_v32 = vsub.f32 %v3715_v1, %v1824_v18 }
 0x23a   :  { %1878 = vmatpush.msra.mxu2 %v3647_v50  ;;  %v1830_v44 = vand.u32 4294901760, %v3730_v49 }
 0x23b   :  { %v1826_v56 = vand.u32 4294901760, %v1825_v32 }
 0x23c   :  { %1881 = vmatpush.msra.mxu2 %v3656_v8  ;;  %v1831_v60 = vsub.f32 %v3730_v49, %v1830_v44 }
 0x23e   :  { %1884 = vmatpush.msra.mxu2 %v3671_v15  ;;  %v1832_v43 = vand.u32 4294901760, %v1831_v60 }
 0x23f   :  { %1614 = vmatmul.f32.vlgmr.msrb.gmra.mxu2 %v1323_v19  ;;  %1659 = vmatmul.f32.gmra.mxu3 %v1331_v7  ;;  %v3686_v19 = vand.u32 4294901760, %v1280_v57 }
 0x240   :  { %1887 = vmatpush.msra.mxu2 %v3683_v5 }
 0x241   :  { %v3698_v2 = vsub.f32 %v1280_v57, %v3686_v19  ;;  %1726 = vmatpush.msra.mxu0 %v3686_v19  ;;  %1939 = vmatpush.msra.mxu3 %v3686_v19  ;;  %v3753_v57 = vand.u32 4294901760, %v1274_v54 }
 0x243   :  { %v1812_v9 = vand.u32 4294901760, %v3698_v2  ;;  %1728 = vmatpush.msra.mxu0 %v3693_v45  ;;  %1890 = vmatpush.msra.mxu2 %v3698_v2  ;;  %v1847_v11 = vsub.f32 %v1274_v54, %v3753_v57 }
 0x244   :  { %1941 = vmatpush.msra.mxu3 %v3693_v45 }
 0x245   :  { %v1813_v46 = vsub.f32 %v3698_v2, %v1812_v9  ;;  %1730 = vmatpush.msra.mxu0 %v3707_v20  ;;  %1893 = vmatpush.msra.mxu2 %v3705_v38  ;;  %v1848_v21 = vand.u32 4294901760, %v1847_v11  ;;  %v2562_v2 = vld [vmem:[%s4048_s3 + $0xb] ss:$0 sm:$0xff] }
 0x246   :  { %1943 = vmatpush.msra.mxu3 %v3707_v20 }
 0x247   :  { %1618 = vmatmul.f32.gmra.mxu2 %v1331_v7  ;;  %v1807_v7 = vsub.f32 %v3683_v5, %v1806_v47  ;;  %v1814_v25 = vand.u32 4294901760, %v1813_v46  ;;  %1732 = vmatpush.msra.mxu0 %v3717_v33  ;;  %v1849_v29 = vsub.f32 %v1847_v11, %v1848_v21 }
 0x248   :  { %1896 = vmatpush.msra.mxu2 %v3715_v1  ;;  %1945 = vmatpush.msra.mxu3 %v3717_v33 }
 0x249   :  { %v1808_v34 = vand.u32 4294901760, %v1807_v7  ;;  %1734 = vmatpush.msra.mxu0 %v3732_v13  ;;  %v1843_v7 = vsub.f32 %v1841_v31, %v1842_v26  ;;  %v1850_v46 = vand.u32 4294901760, %v1849_v29  ;;  %v2092_v29 = vld [vmem:[#allocation3 + $0x2d0] sm:$0xff] }
 0x24a   :  { %1899 = vmatpush.msra.mxu2 %v3730_v49  ;;  %1947 = vmatpush.msra.mxu3 %v3732_v13 }
 0x24b   :  { %1809 = vmatpush.msra.mxu1 %v1808_v34  ;;  %1736 = vmatpush.msra.mxu0 %v3746_v59  ;;  %v1844_v34 = vand.u32 4294901760, %v1843_v7  ;;  %v2093_v7 = vld [vmem:[#allocation3 + $0x2d8] sm:$0xff] }
 0x24c   :  { %1902 = vmatpush.msra.mxu2 %v3742_v28  ;;  %1949 = vmatpush.msra.mxu3 %v3746_v59 }
 0x24d   :  { %1815 = vmatpush.msra.mxu1 %v1814_v25  ;;  %1738 = vmatpush.msra.mxu0 %v3753_v57 }
 0x24e   :  { %1905 = vmatpush.msra.mxu2 %v1841_v31  ;;  %1951 = vmatpush.msra.mxu3 %v3753_v57  ;;  %v2096_v31 = vld [vmem:[#allocation3 + $0x2f0] sm:$0xff] }
 0x24f   :  { %1821 = vmatpush.msra.mxu1 %v1820_v17  ;;  %1968 = vmatpush.msrb.mxu0 %v1758_v61 }
 0x250   :  { %1908 = vmatpush.msra.mxu2 %v1847_v11 }
 0x251   :  { %1827 = vmatpush.msra.mxu1 %v1826_v56  ;;  %1972 = vmatpush.msrb.mxu0 %v1764_v58 }
 0x253   :  { %1833 = vmatpush.msra.mxu1 %v1832_v43  ;;  %1976 = vmatpush.msrb.mxu0 %v1770_v4  ;;  %v2095_v43 = vld [vmem:[#allocation3 + $0x2e8] sm:$0xff] }
 0x255   :  { %1839 = vmatpush.msra.mxu1 %v1838_v40  ;;  %1980 = vmatpush.msrb.mxu0 %v1776_v14  ;;  %v3830_v40 = vand.u32 4294901760, %v2095_v43 }
 0x257   :  { %1845 = vmatpush.msra.mxu1 %v1844_v34  ;;  %1984 = vmatpush.msrb.mxu0 %v1782_v24 }
 0x259   :  { %1851 = vmatpush.msra.mxu1 %v1850_v46  ;;  %1988 = vmatpush.msrb.mxu0 %v1788_v36 }
 0x25b   :  { %2039 = vmatpush.msrb.mxu1 %v3589_v53  ;;  %1992 = vmatpush.msrb.mxu0 %v1794_v3  ;;  %v2560_v3 = vld [vmem:[%s4048_s3 + $0x9] ss:$0 sm:$0xff] }
 0x25d   :  { %2041 = vmatpush.msrb.mxu1 %v3594_v30  ;;  %1996 = vmatpush.msrb.mxu0 %v1800_v22  ;;  %v2561_v22 = vld [vmem:[%s4048_s3 + $0xa] ss:$0 sm:$0xff] }
 0x25f   :  { %2043 = vmatpush.msrb.mxu1 %v3602_v63  ;;  %2000 = vmatpush.msrb.mxu0 %v1806_v47 }
 0x261   :  { %2045 = vmatpush.msrb.mxu1 %v3614_v48  ;;  %2004 = vmatpush.msrb.mxu0 %v1812_v9 }
 0x263   :  { %2047 = vmatpush.msrb.mxu1 %v3628_v0  ;;  %2008 = vmatpush.msrb.mxu0 %v1818_v39  ;;  %v2563_v39 = vld [vmem:[%s4048_s3 + $0xc] ss:$0 sm:$0xff] }
 0x265   :  { %2049 = vmatpush.msrb.mxu1 %v3635_v35  ;;  %2012 = vmatpush.msrb.mxu0 %v1824_v18 }
 0x267   :  { %2051 = vmatpush.msrb.mxu1 %v3649_v16  ;;  %2016 = vmatpush.msrb.mxu0 %v1830_v44 }
 0x269   :  { %2053 = vmatpush.msrb.mxu1 %v3658_v41  ;;  %2020 = vmatpush.msrb.mxu0 %v1836_v51  ;;  %v2559_v41 = vld [vmem:[%s4048_s3 + $0x8] ss:$0 sm:$0xff] }
 0x26b   :  { %2055 = vmatpush.msrb.mxu1 %v3673_v23  ;;  %2024 = vmatpush.msrb.mxu0 %v1842_v26  ;;  %v3828_v26 = vand.u32 4294901760, %v2096_v31 }
 0x26d   :  { %2057 = vmatpush.msrb.mxu1 %v3686_v19  ;;  %2028 = vmatpush.msrb.mxu0 %v1848_v21  ;;  %v2094_v21 = vld [vmem:[#allocation3 + $0x2e0] sm:$0xff] }
 0x26f   :  { %2059 = vmatpush.msrb.mxu1 %v3693_v45 }
 0x271   :  { %2061 = vmatpush.msrb.mxu1 %v3707_v20 }
 0x273   :  { %2063 = vmatpush.msrb.mxu1 %v3717_v33 }
 0x275   :  { %2065 = vmatpush.msrb.mxu1 %v3732_v13 }
 0x277   :  { %2067 = vmatpush.msrb.mxu1 %v3746_v59 }
 0x279   :  { %2069 = vmatpush.msrb.mxu1 %v3753_v57  ;;  %v2097_v57 = vld [vmem:[#allocation3 + $0x2f8] sm:$0xff] }
 0x27a   :  { %v3826_v11 = vand.u32 4294901760, %v2097_v57 }
 0x27c   :  { %2101 = vmatpush.msrb.mxu2 %v3826_v11 }
 0x27e   :  { %2103 = vmatpush.msrb.mxu2 %v3828_v26 }
 0x280   :  { %2105 = vmatpush.msrb.mxu2 %v3830_v40 }
 0x2a6   :  { %v1496_v62 = vpop.f32.mrf.mxu0 }
 0x2a8   :  { %v1540_v12 = vpop.f32.mrf.mxu1 }
 0x2aa   :  { %v1438_v27 = vpop.f32.mrf.mxu3 }
 0x2ae   :  { %v1501_v35 = vpop.f32.mrf.mxu0 }
 0x2b0   :  { %v1546_v16 = vpop.f32.mrf.mxu1 }
 0x2b2   :  { %v1329_v61 = vpop.f32.mrf.mxu2  ;;  %v1442_v53 = vpop.f32.mrf.mxu3 }
 0x2b3   :  { %v1439_v30 = vadd.f32 %v1438_v27, %v1329_v61  ;;  %v3832_v27 = vand.u32 4294901760, %v2094_v21  ;;  %v3834_v61 = vand.u32 4294901760, %v2093_v7 }
 0x2b5   :  { %v1497_v58 = vadd.f32 %v1496_v62, %v1439_v30  ;;  %v3840_v30 = vsub.f32 %v2096_v31, %v3828_v26  ;;  %v3843_v62 = vsub.f32 %v2095_v43, %v3830_v40  ;;  %2107 = vmatpush.msrb.mxu2 %v3832_v27 }
 0x2b7   :  { %v1541_v4 = vadd.f32 %v1540_v12, %v1497_v58  ;;  %2109 = vmatpush.msrb.mxu2 %v3834_v61 }
 0x2ba   :  { %v1337_v63 = vpop.f32.mrf.mxu2  ;;  %v1656_v42 = vpop.f32.mrf.mxu3 }
 0x2bb   :  { %v1443_v48 = vadd.f32 %v1442_v53, %v1337_v63  ;;  %v3837_v53 = vsub.f32 %v2097_v57, %v3826_v11  ;;  %v3846_v63 = vand.u32 4294901760, %v2092_v29 }
 0x2bd   :  { %v1502_v55 = vadd.f32 %v1501_v35, %v1443_v48  ;;  %v3850_v48 = vsub.f32 %v2094_v21, %v3832_v27  ;;  %v3860_v35 = vsub.f32 %v2092_v29, %v3846_v63  ;;  %2111 = vmatpush.msrb.mxu2 %v3846_v63 }
 0x2bf   :  { %v1547_v24 = vadd.f32 %v1546_v16, %v1502_v55  ;;  %v2091_v55 = vld [vmem:[#allocation3 + $0x2c8] sm:$0xff] }
 0x2c2   :  { %v1615_v0 = vpop.f32.mrf.mxu2  ;;  %v1660_v15 = vpop.f32.mrf.mxu3 }
 0x2c3   :  { %v1616_v14 = vadd.f32 %v1615_v0, %v1541_v4  ;;  %v3853_v4 = vsub.f32 %v2093_v7, %v3834_v61  ;;  %v2157_v0 = vand.u32 4294901760, %v3840_v30 }
 0x2c5   :  { %v1657_v50 = vadd.f32 %v1656_v42, %v1616_v14  ;;  %v2151_v42 = vand.u32 4294901760, %v3837_v53  ;;  %v2163_v14 = vand.u32 4294901760, %v3843_v62 }
 0x2c7   :  { %1663 = vst [vmem:[#allocation2 + $0x2] sm:$0xff] %v1657_v50  ;;  %v1686_v9 = vmul.f32 %v2561_v22, %v1657_v50 }
 0x2ca   :  { %v1619_v36 = vpop.f32.mrf.mxu2 }
 0x2cb   :  { %v1620_v8 = vadd.f32 %v1619_v36, %v1547_v24  ;;  %v2169_v24 = vand.u32 4294901760, %v3850_v48  ;;  %v2152_v36 = vsub.f32 %v3837_v53, %v2151_v42 }
 0x2cd   :  { %v1661_v23 = vadd.f32 %v1660_v15, %v1620_v8  ;;  %v2158_v8 = vsub.f32 %v3840_v30, %v2157_v0 }
 0x2ce   :  { %v1667_v5 = vld [vmem:[#allocation2] sm:$0xff] }
 0x2cf   :  { %v1675_v19 = vld [vmem:[#allocation2 + $0x1] sm:$0xff]  ;;  %1664 = vst [vmem:[#allocation2 + $0x12] sm:$0xff] %v1661_v23  ;;  %v1670_v47 = vmul.f32 %v2559_v41, %v1667_v5  ;;  %v1687_v59 = vmul.f32 %v2561_v22, %v1661_v23  ;;  %v3876_v23 = vand.u32 4294901760, %v2091_v55  ;;  %v2153_v22 = vand.u32 4294901760, %v2152_v36 }
 0x2d0   :  { %v1678_v45 = vmul.f32 %v2560_v3, %v1675_v19  ;;  %v1691_v38 = vld [vmem:[#allocation2 + $0x3] sm:$0xff]  ;;  %v2159_v5 = vand.u32 4294901760, %v2158_v8  ;;  %v2170_v19 = vsub.f32 %v3850_v48, %v2169_v24  ;;  %v2084_v8 = vld [vmem:[#allocation3 + $0x290] sm:$0xff] }
 0x2d1   :  { %v1699_v1 = vld [vmem:[#allocation2 + $0x4] sm:$0xff]  ;;  %v1694_v37 = vmul.f32 %v2562_v2, %v1691_v38  ;;  %2154 = vmatpush.msrb.mxu3 %v2153_v22  ;;  %2113 = vmatpush.msrb.mxu2 %v3876_v23 }
 0x2d2   :  { %v1680_v20 = vadd.f32 %v1678_v45, %v1670_v47  ;;  %v1702_v18 = vmul.f32 %v2563_v39, %v1699_v1  ;;  %v2181_v47 = vand.u32 4294901760, %v3860_v35  ;;  %v2171_v1 = vand.u32 4294901760, %v2170_v19 }
 0x2d3   :  { %2160 = vmatpush.msrb.mxu3 %v2159_v5  ;;  %v3972_v5 = vand.u32 4294901760, %v2084_v8 }
 0x2d4   :  { %v1688_v33 = vadd.f32 %v1686_v9, %v1680_v20 }
 0x2d6   :  { %v1696_v6 = vadd.f32 %v1694_v37, %v1688_v33  ;;  %v1668_v49 = vld [vmem:[#allocation2 + $0x10] sm:$0xff]  ;;  %v2182_v33 = vsub.f32 %v3860_v35, %v2181_v47 }
 0x2d7   :  { %v1676_v13 = vld [vmem:[#allocation2 + $0x11] sm:$0xff]  ;;  %v1671_v52 = vmul.f32 %v2559_v41, %v1668_v49  ;;  %v2164_v41 = vsub.f32 %v3843_v62, %v2163_v14 }
 0x2d8   :  { %v1704_v25 = vadd.f32 %v1702_v18, %v1696_v6  ;;  %v1679_v17 = vmul.f32 %v2560_v3, %v1676_v13  ;;  %v1692_v32 = vld [vmem:[#allocation2 + $0x13] sm:$0xff]  ;;  %v2175_v3 = vand.u32 4294901760, %v3853_v4  ;;  %v2183_v49 = vand.u32 4294901760, %v2182_v33 }
 0x2d9   :  { %v1700_v54 = vld [vmem:[#allocation2 + $0x14] sm:$0xff]  ;;  %v1695_v51 = vmul.f32 %v2562_v2, %v1692_v32  ;;  %v3885_v2 = vsub.f32 %v2091_v55, %v3876_v23  ;;  %v2165_v38 = vand.u32 4294901760, %v2164_v41 }
 0x2da   :  { %v3822_v44 = vand.u32 4294901760, %v1704_v25  ;;  %v1681_v28 = vadd.f32 %v1679_v17, %v1671_v52  ;;  %v1703_v10 = vmul.f32 %v2563_v39, %v1700_v54  ;;  %v2176_v20 = vsub.f32 %v3853_v4, %v2175_v3  ;;  %v2089_v17 = vld [vmem:[#allocation3 + $0x2b8] sm:$0xff] }
 0x2db   :  { %v2187_v39 = vand.u32 4294901760, %v3885_v2  ;;  %2166 = vmatpush.msrb.mxu3 %v2165_v38 }
 0x2dc   :  { %1853 = vmatmul.f32.vlgmr.msra.gmra.mxu1 %v3822_v44  ;;  %v1740_v56 = vsub.f32 %v1704_v25, %v3822_v44  ;;  %v1689_v60 = vadd.f32 %v1687_v59, %v1681_v28  ;;  %v2177_v6 = vand.u32 4294901760, %v2176_v20  ;;  %v2090_v25 = vld [vmem:[#allocation3 + $0x2c0] sm:$0xff]  ;;  %v3917_v28 = vand.u32 4294901760, %v2089_v17  ;;  %v2088_v59 = vld [vmem:[#allocation3 + $0x2b0] sm:$0xff] }
 0x2dd   :  { %2314 = vmatpush.msra.mxu1 %v3826_v11  ;;  %v2188_v18 = vsub.f32 %v3885_v2, %v2187_v39  ;;  %2172 = vmatpush.msrb.mxu3 %v2171_v1  ;;  %v3912_v52 = vand.u32 4294901760, %v2090_v25 }
 0x2de   :  { %1911 = vmatmul.f32.vlgmr.msra.gmra.mxu2 %v1740_v56  ;;  %v1741_v34 = vand.u32 4294901760, %v1740_v56  ;;  %v1697_v46 = vadd.f32 %v1695_v51, %v1689_v60  ;;  %v2087_v60 = vld [vmem:[#allocation3 + $0x2a8] sm:$0xff] }
 0x2df   :  { %2316 = vmatpush.msra.mxu1 %v3828_v26  ;;  %2178 = vmatpush.msrb.mxu3 %v2177_v6  ;;  %v2189_v13 = vand.u32 4294901760, %v2188_v18  ;;  %v3915_v32 = vsub.f32 %v2090_v25, %v3912_v52  ;;  %v3937_v43 = vand.u32 4294901760, %v2087_v60 }
 0x2e0   :  { %1955 = vmatmul.f32.vlgmr.msra.gmra.mxu3 %v1741_v34  ;;  %v1742_v58 = vsub.f32 %v1740_v56, %v1741_v34  ;;  %v1705_v12 = vadd.f32 %v1703_v10, %v1697_v46  ;;  %2115 = vmatpush.msrb.mxu2 %v3912_v52  ;;  %v3925_v56 = vand.u32 4294901760, %v2088_v59  ;;  %v2086_v10 = vld [vmem:[#allocation3 + $0x2a0] sm:$0xff] }
 0x2e1   :  { %2318 = vmatpush.msra.mxu1 %v3830_v40  ;;  %2184 = vmatpush.msrb.mxu3 %v2183_v49  ;;  %v2193_v54 = vand.u32 4294901760, %v3915_v32  ;;  %v3947_v34 = vsub.f32 %v2087_v60, %v3937_v43  ;;  %v3951_v46 = vand.u32 4294901760, %v2086_v10 }
 0x2e2   :  { %v1743_v50 = vand.u32 4294901760, %v1742_v58  ;;  %v1747_v16 = vand.u32 4294901760, %v1705_v12  ;;  %2117 = vmatpush.msrb.mxu2 %v3917_v28  ;;  %v3935_v31 = vsub.f32 %v2088_v59, %v3925_v56  ;;  %v2085_v58 = vld [vmem:[#allocation3 + $0x298] sm:$0xff] }
 0x2e3   :  { %2320 = vmatpush.msra.mxu1 %v3832_v27  ;;  %2190 = vmatpush.msrb.mxu3 %v2189_v13  ;;  %v2194_v51 = vsub.f32 %v3915_v32, %v2193_v54  ;;  %v3962_v36 = vsub.f32 %v2086_v10, %v3951_v46 }
 0x2e4   :  { %1744 = vmatmul.f32.vlgmr.msra.gmra.mxu0 %v1743_v50  ;;  %1857 = vmatmul.f32.gmra.mxu1 %v1747_v16  ;;  %v1748_v15 = vsub.f32 %v1705_v12, %v1747_v16  ;;  %v2205_v29 = vand.u32 4294901760, %v3935_v31  ;;  %v2211_v50 = vand.u32 4294901760, %v3947_v34 }
 0x2e5   :  { %2256 = vmatpush.msra.mxu0 %v3837_v53  ;;  %2322 = vmatpush.msra.mxu1 %v3834_v61  ;;  %v2195_v21 = vand.u32 4294901760, %v2194_v51  ;;  %v2217_v19 = vand.u32 4294901760, %v3962_v36 }
 0x2e6   :  { %1916 = vmatmul.f32.gmra.mxu2 %v1748_v15  ;;  %v1749_v45 = vand.u32 4294901760, %v1748_v15  ;;  %v2206_v55 = vsub.f32 %v3935_v31, %v2205_v29 }
 0x2e7   :  { %2259 = vmatpush.msra.mxu0 %v3840_v30  ;;  %2324 = vmatpush.msra.mxu1 %v3846_v63  ;;  %v2218_v33 = vsub.f32 %v3962_v36, %v2217_v19 }
 0x2e8   :  { %1961 = vmatmul.f32.gmra.mxu3 %v1749_v45  ;;  %v1750_v9 = vsub.f32 %v1748_v15, %v1749_v45  ;;  %2119 = vmatpush.msrb.mxu2 %v3925_v56  ;;  %v2207_v41 = vand.u32 4294901760, %v2206_v55  ;;  %v2212_v15 = vsub.f32 %v3947_v34, %v2211_v50  ;;  %v2083_v45 = vld [vmem:[#allocation3 + $0x288] sm:$0xff] }
 0x2e9   :  { %2262 = vmatpush.msra.mxu0 %v3843_v62  ;;  %2326 = vmatpush.msra.mxu1 %v3876_v23  ;;  %v3979_v1 = vand.u32 4294901760, %v2083_v45  ;;  %v2219_v25 = vand.u32 4294901760, %v2218_v33 }
 0x2ea   :  { %v1751_v37 = vand.u32 4294901760, %v1750_v9  ;;  %2121 = vmatpush.msrb.mxu2 %v3937_v43  ;;  %2196 = vmatpush.msrb.mxu3 %v2195_v21  ;;  %v2213_v38 = vand.u32 4294901760, %v2212_v15  ;;  %v2228_v9 = vsub.f32 %v2084_v8, %v3972_v5  ;;  %v2565_v15 = vld [vmem:[%s4047_s2 + $0x3] ss:$0 sm:$0xff] }
 0x2eb   :  { %2265 = vmatpush.msra.mxu0 %v3850_v48  ;;  %2328 = vmatpush.msra.mxu1 %v3912_v52  ;;  %v2234_v49 = vsub.f32 %v2083_v45, %v3979_v1 }
 0x2ec   :  { %1752 = vmatmul.f32.gmra.mxu0 %v1751_v37  ;;  %2071 = vmatmul.f32.vlgmr.msrb.gmra.mxu1 %v3822_v44  ;;  %v2082_v37 = vld [vmem:[#allocation3 + $0x280] sm:$0xff]  ;;  %v2229_v18 = vand.u32 4294901760, %v2228_v9 }
 0x2ed   :  { %2268 = vmatpush.msra.mxu0 %v3853_v4  ;;  %2330 = vmatpush.msra.mxu1 %v3917_v28  ;;  %v3987_v13 = vand.u32 4294901760, %v2082_v37  ;;  %v2235_v60 = vand.u32 4294901760, %v2234_v49 }
 0x2ee   :  { %2123 = vmatpush.msrb.mxu2 %v3951_v46  ;;  %v2230_v59 = vsub.f32 %v2228_v9, %v2229_v18 }
 0x2ef   :  { %2271 = vmatpush.msra.mxu0 %v3860_v35  ;;  %2332 = vmatpush.msra.mxu1 %v3925_v56  ;;  %v2240_v51 = vsub.f32 %v2082_v37, %v3987_v13  ;;  %v2236_v21 = vsub.f32 %v2234_v49, %v2235_v60 }
 0x2f0   :  { %v2231_v10 = vand.u32 4294901760, %v2230_v59 }
 0x2f1   :  { %2274 = vmatpush.msra.mxu0 %v3885_v2  ;;  %2334 = vmatpush.msra.mxu1 %v3937_v43 }
 0x2f3   :  { %2277 = vmatpush.msra.mxu0 %v3915_v32  ;;  %2336 = vmatpush.msra.mxu1 %v3951_v46 }
 0x2f4   :  { %2030 = vmatmul.f32.vlgmr.msrb.gmra.mxu0 %v3822_v44  ;;  %2075 = vmatmul.f32.gmra.mxu1 %v1747_v16  ;;  %v3923_v44 = vsub.f32 %v2089_v17, %v3917_v28 }
 0x2f6   :  { %v2199_v57 = vand.u32 4294901760, %v3923_v44  ;;  %2280 = vmatpush.msra.mxu0 %v3923_v44 }
 0x2f8   :  { %v2200_v7 = vsub.f32 %v3923_v44, %v2199_v57  ;;  %2283 = vmatpush.msra.mxu0 %v3935_v31 }
 0x2fa   :  { %v2201_v12 = vand.u32 4294901760, %v2200_v7  ;;  %2286 = vmatpush.msra.mxu0 %v3947_v34  ;;  %v2241_v7 = vand.u32 4294901760, %v2240_v51 }
 0x2fc   :  { %2034 = vmatmul.f32.gmra.mxu0 %v1747_v16  ;;  %v3958_v16 = vand.u32 4294901760, %v2085_v58  ;;  %2202 = vmatpush.msrb.mxu3 %v2201_v12  ;;  %v2242_v12 = vsub.f32 %v2240_v51, %v2241_v7 }
 0x2fd   :  { %2289 = vmatpush.msra.mxu0 %v3962_v36 }
 0x2fe   :  { %v3970_v22 = vsub.f32 %v2085_v58, %v3958_v16  ;;  %2125 = vmatpush.msrb.mxu2 %v3958_v16  ;;  %2208 = vmatpush.msrb.mxu3 %v2207_v41  ;;  %v2237_v58 = vand.u32 4294901760, %v2236_v21  ;;  %v2243_v55 = vand.u32 4294901760, %v2242_v12 }
 0x2ff   :  { %2338 = vmatpush.msra.mxu1 %v3958_v16 }
 0x300   :  { %v2223_v20 = vand.u32 4294901760, %v3970_v22  ;;  %2127 = vmatpush.msrb.mxu2 %v3972_v5  ;;  %2292 = vmatpush.msra.mxu0 %v3970_v22 }
 0x301   :  { %2214 = vmatpush.msrb.mxu3 %v2213_v38  ;;  %2340 = vmatpush.msra.mxu1 %v3972_v5 }
 0x302   :  { %v2224_v6 = vsub.f32 %v3970_v22, %v2223_v20  ;;  %2129 = vmatpush.msrb.mxu2 %v3979_v1  ;;  %2295 = vmatpush.msra.mxu0 %v2228_v9  ;;  %v2472_v9 = vlaneseq }
 0x303   :  { %2342 = vmatpush.msra.mxu1 %v3979_v1  ;;  %2220 = vmatpush.msrb.mxu3 %v2219_v25 }
 0x304   :  { %v2225_v17 = vand.u32 4294901760, %v2224_v6  ;;  %2131 = vmatpush.msrb.mxu2 %v3987_v13  ;;  %2298 = vmatpush.msra.mxu0 %v2234_v49  ;;  %v2473_v6 = vand.u32 127, %v2472_v9 }
 0x305   :  { %2344 = vmatpush.msra.mxu1 %v3987_v13 }
 0x306   :  { %2361 = vmatpush.msra.mxu2 %v2151_v42  ;;  %2226 = vmatpush.msrb.mxu3 %v2225_v17  ;;  %vm2474_vm0 = vcmp.lt.s32.totalorder %v2473_v6, 16 }
 0x307   :  { %2301 = vmatpush.msra.mxu0 %v2240_v51 }
 0x308   :  { %2365 = vmatpush.msra.mxu2 %v2157_v0  ;;  %2232 = vmatpush.msrb.mxu3 %v2231_v10 }
 0x30a   :  { %2369 = vmatpush.msra.mxu2 %v2163_v14  ;;  %2238 = vmatpush.msrb.mxu3 %v2237_v58 }
 0x30c   :  { %2373 = vmatpush.msra.mxu2 %v2169_v24  ;;  %2244 = vmatpush.msrb.mxu3 %v2243_v55 }
 0x30e   :  { %2432 = vmatpush.msra.mxu3 %v3826_v11  ;;  %2377 = vmatpush.msra.mxu2 %v2175_v3 }
 0x310   :  { %2434 = vmatpush.msra.mxu3 %v3828_v26  ;;  %2381 = vmatpush.msra.mxu2 %v2181_v47  ;;  %v2564_v26 = vld [vmem:[%s4047_s2 + $0x2] ss:$0 sm:$0xff]  ;;  %s2630_s2 = smov [#allocation6]  }
 0x311   :  { %s2527_s25 = sshll.u32 %s2630_s2, 4  ;;  %s2528_s25 = int_to_ptr.vmem [resolvable:$true] %s2527_s25 }
 0x312   :  { %2436 = vmatpush.msra.mxu3 %v3830_v40  ;;  %2385 = vmatpush.msra.mxu2 %v2187_v39 }
 0x314   :  { %2438 = vmatpush.msra.mxu3 %v3832_v27  ;;  %2389 = vmatpush.msra.mxu2 %v2193_v54 }
 0x316   :  { %2440 = vmatpush.msra.mxu3 %v3834_v61  ;;  %2393 = vmatpush.msra.mxu2 %v2199_v57 }
 0x318   :  { %2442 = vmatpush.msra.mxu3 %v3846_v63  ;;  %2397 = vmatpush.msra.mxu2 %v2205_v29 }
 0x31a   :  { %2444 = vmatpush.msra.mxu3 %v3876_v23  ;;  %2401 = vmatpush.msra.mxu2 %v2211_v50 }
 0x31c   :  { %2446 = vmatpush.msra.mxu3 %v3912_v52  ;;  %2405 = vmatpush.msra.mxu2 %v2217_v19 }
 0x31e   :  { %2448 = vmatpush.msra.mxu3 %v3917_v28  ;;  %2409 = vmatpush.msra.mxu2 %v2223_v20 }
 0x320   :  { %2450 = vmatpush.msra.mxu3 %v3925_v56  ;;  %2413 = vmatpush.msra.mxu2 %v2229_v18 }
 0x322   :  { %2452 = vmatpush.msra.mxu3 %v3937_v43  ;;  %2417 = vmatpush.msra.mxu2 %v2235_v60 }
 0x324   :  { %2454 = vmatpush.msra.mxu3 %v3951_v46  ;;  %2421 = vmatpush.msra.mxu2 %v2241_v7 }
 0x326   :  { %2456 = vmatpush.msra.mxu3 %v3958_v16 }
 0x328   :  { %2458 = vmatpush.msra.mxu3 %v3972_v5 }
 0x32a   :  { %2460 = vmatpush.msra.mxu3 %v3979_v1 }
 0x32c   :  { %2462 = vmatpush.msra.mxu3 %v3987_v13 }
 0x359   :  { %v1854_v11 = vpop.f32.mrf.mxu1 }
 0x361   :  { %v1745_v40 = vpop.f32.mrf.mxu0  ;;  %v1858_v61 = vpop.f32.mrf.mxu1 }
 0x362   :  { %v1746_v27 = vadd.f32 %v2564_v26, %v1745_v40  ;;  %v1912_v30 = vpop.f32.mrf.mxu2 }
 0x363   :  { %v1956_v4 = vpop.f32.mrf.mxu3 }
 0x364   :  { %v1855_v53 = vadd.f32 %v1854_v11, %v1746_v27 }
 0x366   :  { %v1913_v63 = vadd.f32 %v1912_v30, %v1855_v53 }
 0x368   :  { %v1957_v42 = vadd.f32 %v1956_v4, %v1913_v63 }
 0x369   :  { %v1753_v62 = vpop.f32.mrf.mxu0  ;;  %v2072_v14 = vpop.f32.mrf.mxu1 }
 0x36a   :  { %v1754_v48 = vadd.f32 %v2564_v26, %v1753_v62  ;;  %v1917_v3 = vpop.f32.mrf.mxu2 }
 0x36b   :  { %v1962_v39 = vpop.f32.mrf.mxu3 }
 0x36c   :  { %v1859_v0 = vadd.f32 %v1858_v61, %v1754_v48 }
 0x36e   :  { %v1918_v23 = vadd.f32 %v1917_v3, %v1859_v0 }
 0x370   :  { %v1963_v52 = vadd.f32 %v1962_v39, %v1918_v23 }
 0x371   :  { %v2031_v35 = vpop.f32.mrf.mxu0  ;;  %v2076_v56 = vpop.f32.mrf.mxu1 }
 0x372   :  { %v2032_v24 = vadd.f32 %v2031_v35, %v1957_v42 }
 0x374   :  { %v2073_v47 = vadd.f32 %v2072_v14, %v2032_v24 }
 0x376   :  { %v2079_v2 = vmax.f32 %v2073_v47, 0.0 }
 0x378   :  { %v2132_v32 = vand.u32 4294901760, %v2079_v2 }
 0x379   :  { %v2035_v28 = vpop.f32.mrf.mxu0 }
 0x37a   :  { %v2133_v54 = vsub.f32 %v2079_v2, %v2132_v32  ;;  %v2036_v44 = vadd.f32 %v2035_v28, %v1963_v52  ;;  %2246 = vmatmul.f32.vlgmr.msrb.gmra.mxu3 %v2132_v32 }
 0x37c   :  { %v2077_v57 = vadd.f32 %v2076_v56, %v2036_v44  ;;  %2304 = vmatmul.f32.vlgmr.msra.gmra.mxu0 %v2133_v54  ;;  %v2134_v31 = vand.u32 4294901760, %v2133_v54 }
 0x37e   :  { %v2080_v43 = vmax.f32 %v2077_v57, 0.0  ;;  %2348 = vmatmul.f32.vlgmr.msra.gmra.mxu1 %v2134_v31  ;;  %v2135_v29 = vsub.f32 %v2133_v54, %v2134_v31 }
 0x380   :  { %v2140_v34 = vand.u32 4294901760, %v2080_v43  ;;  %v2136_v46 = vand.u32 4294901760, %v2135_v29 }
 0x382   :  { %2137 = vmatmul.f32.vlgmr.msrb.gmra.mxu2 %v2136_v46  ;;  %2250 = vmatmul.f32.gmra.mxu3 %v2140_v34  ;;  %v2141_v50 = vsub.f32 %v2080_v43, %v2140_v34 }
 0x384   :  { %2309 = vmatmul.f32.gmra.mxu0 %v2141_v50  ;;  %v2142_v16 = vand.u32 4294901760, %v2141_v50 }
 0x386   :  { %2354 = vmatmul.f32.gmra.mxu1 %v2142_v16  ;;  %v2143_v36 = vsub.f32 %v2141_v50, %v2142_v16 }
 0x388   :  { %v2144_v8 = vand.u32 4294901760, %v2143_v36 }
 0x38a   :  { %2145 = vmatmul.f32.gmra.mxu2 %v2144_v8  ;;  %2464 = vmatmul.f32.vlgmr.msra.gmra.mxu3 %v2132_v32 }
 0x392   :  { %2423 = vmatmul.f32.vlgmr.msra.gmra.mxu2 %v2132_v32  ;;  %2468 = vmatmul.f32.gmra.mxu3 %v2140_v34 }
 0x39a   :  { %2427 = vmatmul.f32.gmra.mxu2 %v2140_v34 }
 0x3f9   :  { %v2305_v38 = vpop.f32.mrf.mxu0 }
 0x3fb   :  { %v2349_v37 = vpop.f32.mrf.mxu1 }
 0x3fd   :  { %v2247_v41 = vpop.f32.mrf.mxu3 }
 0x401   :  { %v2310_v59 = vpop.f32.mrf.mxu0 }
 0x403   :  { %v2355_v21 = vpop.f32.mrf.mxu1 }
 0x405   :  { %v2138_v22 = vpop.f32.mrf.mxu2  ;;  %v2251_v19 = vpop.f32.mrf.mxu3 }
 0x406   :  { %v2139_v5 = vadd.f32 %v2565_v15, %v2138_v22 }
 0x408   :  { %v2248_v45 = vadd.f32 %v2247_v41, %v2139_v5 }
 0x40a   :  { %v2306_v33 = vadd.f32 %v2305_v38, %v2248_v45 }
 0x40c   :  { %v2350_v49 = vadd.f32 %v2349_v37, %v2306_v33 }
 0x40d   :  { %v2146_v20 = vpop.f32.mrf.mxu2  ;;  %v2465_v13 = vpop.f32.mrf.mxu3 }
 0x40e   :  { %v2147_v1 = vadd.f32 %v2565_v15, %v2146_v20 }
 0x410   :  { %v2252_v18 = vadd.f32 %v2251_v19, %v2147_v1 }
 0x412   :  { %v2311_v51 = vadd.f32 %v2310_v59, %v2252_v18 }
 0x414   :  { %v2356_v7 = vadd.f32 %v2355_v21, %v2311_v51 }
 0x415   :  { %v2424_v25 = vpop.f32.mrf.mxu2  ;;  %v2469_v55 = vpop.f32.mrf.mxu3 }
 0x416   :  { %v2425_v17 = vadd.f32 %v2424_v25, %v2350_v49 }
 0x418   :  { %v2466_v60 = vadd.f32 %v2465_v13, %v2425_v17 }
 0x41a   :  { %v2475_v10 = vsel %vm2474_vm0, %v2466_v60, -1e+30 }
 0x41b   :  { %2477 = vmax.xlane.f32.xlu0 %v2475_v10 }
 0x41d   :  { %v2428_v58 = vpop.f32.mrf.mxu2 }
 0x41e   :  { %v2429_v12 = vadd.f32 %v2428_v58, %v2356_v7 }
 0x420   :  { %v2470_v11 = vadd.f32 %v2469_v55, %v2429_v12 }
 0x422   :  { %v2476_v26 = vsel %vm2474_vm0, %v2470_v11, -1e+30 }
 0x423   :  { %2479 = vmax.xlane.f32.xlu0 %v2476_v26 }
 0x48e   :  { %v2478_v40 = vpop.xlane.xlu0 %2477 }
 0x48f   :  { %v2481_v27 = vsub.f32 %v2475_v10, %v2478_v40 }
 0x491   :  { %v2483_v61 = vmul.f32 1.442695, %v2481_v27 }
 0x493   :  { %2566 = vpow2.f32 %v2483_v61 }
 0x496   :  { %v2480_v53 = vpop.xlane.xlu0 %2479 }
 0x497   :  { %v2482_v30 = vsub.f32 %v2476_v26, %v2480_v53 }
 0x499   :  { %v2567_v62 = vpop.eup %2566  ;;  %v2485_v63 = vmul.f32 1.442695, %v2482_v30 }
 0x49a   :  { %2487 = vadd.xlane.f32.xlu1 %v2567_v62 }
 0x49b   :  { %2568 = vpow2.f32 %v2485_v63 }
 0x4a1   :  { %v2569_v48 = vpop.eup %2568 }
 0x4a2   :  { %2489 = vadd.xlane.f32.xlu1 %v2569_v48 }
 0x50d   :  { %v2488_v4 = vpop.xlane.xlu1 %2487 }
 0x50e   :  { %2570 = vrcp.f32 %v2488_v4  ;;  %v2502_v24 = vand.u32 2147483648, %v2488_v4  ;;  %v2500_v23 = vand.u32 2147483647, %v2488_v4  ;;  %vm2496_vm2 = vweird.f32 %v2488_v4 }
 0x510   :  { %v2503_v39 = vor.u32 1.1754944e-38, %v2502_v24  ;;  %vm2501_vm4 = vcmp.eq.f32.partialorder %v2500_v23, 8.507059e+37 }
 0x514   :  { %v2571_v42 = vpop.eup %2570 }
 0x515   :  { %v2492_v0 = vmul.f32 %v2571_v42, %v2488_v4  ;;  %v2490_v14 = vpop.xlane.xlu1 %2489  ;;  %vm2497_vm1 = vweird.f32 %v2571_v42 }
 0x516   :  { %2572 = vrcp.f32 %v2490_v14  ;;  %vm2498_vm3 = vmor %vm2496_vm2, %vm2497_vm1  ;;  %v2516_v56 = vand.u32 2147483648, %v2490_v14  ;;  %v2514_v31 = vand.u32 2147483647, %v2490_v14  ;;  %vm2510_vm6 = vweird.f32 %v2490_v14 }
 0x517   :  { %v2493_v35 = vsub.f32 1.0, %v2492_v0 }
 0x518   :  { %v2517_v29 = vor.u32 1.1754944e-38, %v2516_v56  ;;  %vm2515_vm8 = vcmp.eq.f32.partialorder %v2514_v31, 8.507059e+37 }
 0x519   :  { %v2494_v3 = vmul.f32 %v2571_v42, %v2493_v35 }
 0x51b   :  { %v2495_v47 = vadd.f32 %v2571_v42, %v2494_v3 }
 0x51c   :  { %v2573_v2 = vpop.eup %2572 }
 0x51d   :  { %v2506_v52 = vmul.f32 %v2573_v2, %v2490_v14  ;;  %v2499_v32 = vsel %vm2498_vm3, %v2571_v42, %v2495_v47  ;;  %vm2511_vm5 = vweird.f32 %v2573_v2 }
 0x51e   :  { %v2504_v28 = vsel %vm2501_vm4, %v2503_v39, %v2499_v32  ;;  %vm2512_vm7 = vmor %vm2510_vm6, %vm2511_vm5 }
 0x51f   :  { %v2507_v54 = vsub.f32 1.0, %v2506_v52  ;;  %v2519_v44 = vmul.f32 %v2567_v62, %v2504_v28 }
 0x521   :  { %v2508_v57 = vmul.f32 %v2573_v2, %v2507_v54  ;;  %2521 = vst [vmem:[#allocation6] sm:$0xff] %v2519_v44 }
 0x523   :  { %v2509_v43 = vadd.f32 %v2573_v2, %v2508_v57 }
 0x525   :  { %v2513_v34 = vsel %vm2512_vm7, %v2573_v2, %v2509_v43 }
 0x526   :  { %v2518_v46 = vsel %vm2515_vm8, %v2517_v29, %v2513_v34 }
 0x527   :  { %v2520_v50 = vmul.f32 %v2569_v48, %v2518_v46 }
 0x529   :  { %2522 = vst [vmem:[#allocation6 + $0x8] sm:$0xff] %v2520_v50 }
 0x52a   :  { %2535 = dma.vmem_to_hbm [thread:$0]  %s2528_s25, 256, %s2530_s28, [#allocation5], %s2627_s20, %s2627_s20, %s2628_s21  }
 0x52b   :  { %2624 = dma.done.wait [#allocation5], 256  }
 0x52c   :  { %2625 = vsyncadd [#allocation5], 4294967040 }
 0x52d   :  { %2540 = vsyncpa [#allocation4], 1 }
 0x52e   :  { %2541 = vsyncpa [#allocation5], 1 }

</bundles_post_ra>
